<compile_context>
chip_gen: v5e
topology: v5e:2x2
jax: 0.10.0
libtpu: 0.0.40
codegen_flags: <defaults>
</compile_context>

<pallas_src>
import functools
import math

import jax
import jax.numpy as jnp
from jax import lax
from jax.experimental import pallas as pl
from jax.experimental.pallas import tpu as pltpu  # noqa: F401  (kept for TPU-specific tuning hooks)

# ----------------------------- synthetic "BERT" config ------------------------
VOCAB_SIZE = 100
HIDDEN = 32
NUM_LAYERS = 2
NUM_HEADS = 2
HEAD_DIM = HIDDEN // NUM_HEADS
INTERMEDIATE = 64
MAX_POS = 32
TYPE_VOCAB = 2
NUM_CLASS = 8
LN_EPS = 1e-12
NEG_INF = -1e9

# ---------------- packed-vector row layout (one [VEC_ROWS,128] input) ---------
VROW_EMB_G = 0
VROW_EMB_B = 1
VROW_LAYER0 = 2
VROWS_PER_LAYER = 8
(VOFF_BQKV, VOFF_BO, VOFF_LN1G, VOFF_LN1B,
 VOFF_B1, VOFF_B2, VOFF_LN2G, VOFF_LN2B) = range(8)
VROW_FCB = VROW_LAYER0 + NUM_LAYERS * VROWS_PER_LAYER   # 18
VROW_START = VROW_FCB + 1                               # 19
VROW_END = VROW_FCB + 2                                 # 20
VROW_COLMAX = VROW_FCB + 3                              # 21
VEC_ROWS = ((VROW_COLMAX + 1 + 7) // 8) * 8             # 24


# ----------------------------- fused forward kernel ---------------------------
def _fused_ner_kernel(data_ref, emb_ref, wqkv_ref, wo_ref, w1_ref, w2_ref,
                      fcw_ref, crf_ref, vec_ref, loss_ref, *, batch, seqlen):
    f32 = jnp.float32
    n_tok = batch * seqlen
    C = NUM_CLASS

    vec = vec_ref[...]                                   # [VEC_ROWS, 128]

    def vrow(r, w):                                      # packed vector row -> [1, w]
        return vec[r:r + 1, 0:w]

    def layer_norm(v, g, b):
        mu = jnp.mean(v, axis=-1, keepdims=True)
        vc = v - mu
        var = jnp.mean(vc * vc, axis=-1, keepdims=True)
        return vc * lax.rsqrt(var + LN_EPS) * g + b

    def gelu(v):
        # TODO(synk): HF BERT uses erf-GELU; tanh approximation gives a small systematic diff.
        c = math.sqrt(2.0 / math.pi)
        return 0.5 * v * (1.0 + jnp.tanh(c * (v + 0.044715 * v * v * v)))

    # -------- decode the packed per-token int32 data (time-major rows) --------
    data = data_ref[...]                                 # [N, 6] int32
    word_id = data[:, 0:1]
    tag_id = data[:, 1:2]
    key_valid = data[:, 2:3].astype(f32)                 # [N,1] attention key mask
    cmask = data[:, 3:4].astype(f32)                     # [N,1] CRF mask
    bid = data[:, 4:5]                                   # [N,1] batch id
    pos_id = data[:, 5:6]                                # [N,1] timestep / position

    # -------- embeddings: word + position + token-type(0) in ONE matmul --------
    tab_rows = VOCAB_SIZE + MAX_POS + 1
    col = lax.broadcasted_iota(jnp.int32, (n_tok, tab_rows), 1)
    onehot = ((col == word_id)
              | (col == pos_id + VOCAB_SIZE)
              | (col == tab_rows - 1)).astype(f32)       # [N, V+P+1]
    x = jnp.dot(onehot, emb_ref[...], preferred_element_type=f32)        # [N, H]
    x = layer_norm(x, vrow(VROW_EMB_G, HIDDEN), vrow(VROW_EMB_B, HIDDEN))

    # -------- block-diagonal + key-valid attention bias, built in-kernel -------
    bh = (lax.broadcasted_iota(jnp.int32, (n_tok, batch), 1) == bid).astype(f32)   # [N, B]
    allowed = lax.dot_general(bh, bh * key_valid, (((1,), (1,)), ((), ())),
                              preferred_element_type=f32)                # [N, N] in {0,1}
    bias = (allowed - 1.0) * (-NEG_INF) * (-1.0)         # 0 where allowed, -1e9 elsewhere
    bias = (allowed - 1.0) * 1e9

    # -------------------- encoder (all weights resident in VMEM) --------------
    scale = 1.0 / math.sqrt(HEAD_DIM)
    for l in range(NUM_LAYERS):
        base = VROW_LAYER0 + l * VROWS_PER_LAYER
        # fused QKV projection: one matmul, heads split with static lane slices.
        qkv = (jnp.dot(x, wqkv_ref[l], preferred_element_type=f32)
               + vrow(base + VOFF_BQKV, 3 * HIDDEN))                     # [N, 3H]
        ctxs = []
        for h in range(NUM_HEADS):
            q = qkv[:, h * HEAD_DIM:(h + 1) * HEAD_DIM]
            k = qkv[:, HIDDEN + h * HEAD_DIM:HIDDEN + (h + 1) * HEAD_DIM]
            v = qkv[:, 2 * HIDDEN + h * HEAD_DIM:2 * HIDDEN + (h + 1) * HEAD_DIM]
            s = lax.dot_general(q, k, (((1,), (1,)), ((), ())),
                                preferred_element_type=f32) * scale + bias   # [N, N]
            m = jnp.max(s, axis=-1, keepdims=True)
            p = jnp.exp(s - m)
            p = p * pl.reciprocal(jnp.sum(p, axis=-1, keepdims=True), approx=True)
            ctxs.append(jnp.dot(p, v, preferred_element_type=f32))          # [N, dh]
        ctx = jnp.concatenate(ctxs, axis=-1)                                 # [N, H]
        attn = (jnp.dot(ctx, wo_ref[l], preferred_element_type=f32)
                + vrow(base + VOFF_BO, HIDDEN))
        x = layer_norm(x + attn, vrow(base + VOFF_LN1G, HIDDEN),
                       vrow(base + VOFF_LN1B, HIDDEN))
        hmid = gelu(jnp.dot(x, w1_ref[l], preferred_element_type=f32)
                    + vrow(base + VOFF_B1, INTERMEDIATE))
        ffn = (jnp.dot(hmid, w2_ref[l], preferred_element_type=f32)
               + vrow(base + VOFF_B2, HIDDEN))
        x = layer_norm(x + ffn, vrow(base + VOFF_LN2G, HIDDEN),
                       vrow(base + VOFF_LN2B, HIDDEN))

    # -------------------- fc projection fused in (logits stay in VMEM) --------
    logits = (jnp.dot(x, fcw_ref[...], preferred_element_type=f32)
              + vrow(VROW_FCB, C))                                        # [N, C]

    # -------------------- batched linear-chain CRF log-likelihood -------------
    trans = crf_ref[0:C, :]                     # [C, C]  trans[i, j] = score(i -> j)
    expT = crf_ref[C:2 * C, :]                  # [C, C]  exp(trans - colmax)
    colmax = vrow(VROW_COLMAX, C)               # [1, C]
    start = vrow(VROW_START, C)                 # [1, C]
    end = vrow(VROW_END, C)                     # [1, C]

    # one-hot gold tags built in-kernel (time-major)
    tags = (lax.broadcasted_iota(jnp.int32, (n_tok, C), 1) == tag_id).astype(f32)  # [N, C]

    emit0 = logits[0:batch, :]
    tag0 = tags[0:batch, :]

    # --- gold-path numerator, fully vectorized & hoisted out of the time loop ---
    # (torchcrf requires mask[:, 0] == 1 and a left-aligned mask; assumed here)
    num = jnp.sum((start + emit0) * tag0)
    pair = jnp.dot(tags[0:n_tok - batch, :], trans,
                   preferred_element_type=f32)                            # [N-B, C]
    num = num + jnp.sum(cmask[batch:, :] *
                        jnp.sum((pair + logits[batch:, :]) * tags[batch:, :],
                                axis=-1, keepdims=True))
    # end-transition at the last valid step of each sequence
    end_scores = jnp.sum(tags * end, axis=-1, keepdims=True)              # [N, 1]
    is_last_head = cmask[0:n_tok - batch, :] * (1.0 - cmask[batch:, :])   # [N-B, 1]
    num = num + jnp.sum(is_last_head * end_scores[0:n_tok - batch, :])
    num = num + jnp.sum(cmask[n_tok - batch:, :] * end_scores[n_tok - batch:, :])

    # --- log-partition: forward recursion, one tiny [B,C]@[C,C] MXU matmul/step ---
    alpha = start + emit0                                                 # [B, C]
    for t in range(1, seqlen):
        # TODO(synk): for long seqlen convert to lax.fori_loop with pl.ds slicing.
        m_b = jnp.max(alpha, axis=-1, keepdims=True)                      # [B, 1]
        ex = jnp.exp(alpha - m_b)                                         # [B, C]
        new_alpha = (m_b + colmax
                     + jnp.log(jnp.dot(ex, expT, preferred_element_type=f32))
                     + logits[t * batch:(t + 1) * batch, :])
        mask_t = cmask[t * batch:(t + 1) * batch, :]
        alpha = jnp.where(mask_t > 0.0, new_alpha, alpha)
    final = alpha + end
    mf = jnp.max(final, axis=-1, keepdims=True)
    log_z = mf + jnp.log(jnp.sum(jnp.exp(final - mf), axis=-1, keepdims=True))  # [B, 1]

    # loss = -mean_b(llh_b)   (CRF returns per-sequence llh, .mean() over batch)
    loss = -(num - jnp.sum(log_z)) * (1.0 / batch)
    loss_ref[...] = jnp.broadcast_to(loss, (1, 1))


# ----------------------------- parameters (deterministic) ---------------------
def init_params(key):
    def normal(k, shape, std=0.02):
        return std * jax.random.normal(k, shape, dtype=jnp.float32)

    keys = iter(jax.random.split(key, 64))
    p = {
        "word_emb": normal(next(keys), (VOCAB_SIZE, HIDDEN)),
        "pos_emb": normal(next(keys), (MAX_POS, HIDDEN)),
        "type_emb": normal(next(keys), (TYPE_VOCAB, HIDDEN)),
        "emb_ln_g": jnp.ones((HIDDEN,), jnp.float32),
        "emb_ln_b": jnp.zeros((HIDDEN,), jnp.float32),
        "layers": [],
    }
    for _ in range(NUM_LAYERS):
        p["layers"].append({
            "wq": normal(next(keys), (HIDDEN, HIDDEN)), "bq": jnp.zeros((HIDDEN,), jnp.float32),
            "wk": normal(next(keys), (HIDDEN, HIDDEN)), "bk": jnp.zeros((HIDDEN,), jnp.float32),
            "wv": normal(next(keys), (HIDDEN, HIDDEN)), "bv": jnp.zeros((HIDDEN,), jnp.float32),
            "wo": normal(next(keys), (HIDDEN, HIDDEN)), "bo": jnp.zeros((HIDDEN,), jnp.float32),
            "ln1_g": jnp.ones((HIDDEN,), jnp.float32), "ln1_b": jnp.zeros((HIDDEN,), jnp.float32),
            "w1": normal(next(keys), (HIDDEN, INTERMEDIATE)), "b1": jnp.zeros((INTERMEDIATE,), jnp.float32),
            "w2": normal(next(keys), (INTERMEDIATE, HIDDEN)), "b2": jnp.zeros((HIDDEN,), jnp.float32),
            "ln2_g": jnp.ones((HIDDEN,), jnp.float32), "ln2_b": jnp.zeros((HIDDEN,), jnp.float32),
        })
    p["fc_w"] = normal(next(keys), (HIDDEN, NUM_CLASS))
    p["fc_b"] = jnp.zeros((NUM_CLASS,), jnp.float32)
    p["crf_trans"] = jax.random.uniform(next(keys), (NUM_CLASS, NUM_CLASS),
                                        minval=-0.1, maxval=0.1, dtype=jnp.float32)
    p["crf_start"] = jax.random.uniform(next(keys), (NUM_CLASS,),
                                        minval=-0.1, maxval=0.1, dtype=jnp.float32)
    p["crf_end"] = jax.random.uniform(next(keys), (NUM_CLASS,),
                                      minval=-0.1, maxval=0.1, dtype=jnp.float32)
    return p


def pack_params(p):
    """Pack weights into 8 kernel inputs (done once, outside jit).

    TODO(synk): at real BERT dims cast the matmul weights to bf16 here (f32
    accumulation stays in-kernel) to halve VMEM/DMA and hit native MXU rate.
    """
    assert 3 * HIDDEN <= 128 and INTERMEDIATE <= 128  # vector rows must fit 128 lanes
    L = NUM_LAYERS

    def row(v):
        v = jnp.asarray(v, jnp.float32).reshape(-1)
        return jnp.pad(v, (0, 128 - v.shape[0]))

    rows = [None] * VEC_ROWS
    rows[VROW_EMB_G] = row(p["emb_ln_g"])
    rows[VROW_EMB_B] = row(p["emb_ln_b"])
    for l in range(L):
        lay = p["layers"][l]
        base = VROW_LAYER0 + l * VROWS_PER_LAYER
        rows[base + VOFF_BQKV] = row(jnp.concatenate([lay["bq"], lay["bk"], lay["bv"]]))
        rows[base + VOFF_BO] = row(lay["bo"])
        rows[base + VOFF_LN1G] = row(lay["ln1_g"])
        rows[base + VOFF_LN1B] = row(lay["ln1_b"])
        rows[base + VOFF_B1] = row(lay["b1"])
        rows[base + VOFF_B2] = row(lay["b2"])
        rows[base + VOFF_LN2G] = row(lay["ln2_g"])
        rows[base + VOFF_LN2B] = row(lay["ln2_b"])
    rows[VROW_FCB] = row(p["fc_b"])
    rows[VROW_START] = row(p["crf_start"])
    rows[VROW_END] = row(p["crf_end"])
    colmax = jnp.max(p["crf_trans"], axis=0)            # max over source tag i
    rows[VROW_COLMAX] = row(colmax)
    zero = jnp.zeros((128,), jnp.float32)
    vecs = jnp.stack([r if r is not None else zero for r in rows])       # [24, 128]

    # combined embedding table: [word | position | token-type-0]  -> one matmul
    emb_tab = jnp.concatenate([p["word_emb"], p["pos_emb"], p["type_emb"][0:1]], axis=0)
    wqkv = jnp.stack([jnp.concatenate(
        [p["layers"][l]["wq"], p["layers"][l]["wk"], p["layers"][l]["wv"]], axis=1)
        for l in range(L)])                                              # [L, H, 3H]
    wo = jnp.stack([p["layers"][l]["wo"] for l in range(L)])             # [L, H, H]
    w1 = jnp.stack([p["layers"][l]["w1"] for l in range(L)])             # [L, H, I]
    w2 = jnp.stack([p["layers"][l]["w2"] for l in range(L)])             # [L, I, H]
    crf = jnp.concatenate([p["crf_trans"],
                           jnp.exp(p["crf_trans"] - colmax[None, :])], axis=0)  # [2C, C]
    return {"vecs": vecs, "emb_tab": emb_tab, "wqkv": wqkv, "wo": wo,
            "w1": w1, "w2": w2, "fc_w": p["fc_w"], "crf": crf}


# ----------------------------- forward pass ------------------------------------
def ner_forward(params, src_tensor, src_attn_mask, tgt_tensor, tgt_mask):
    b, s = src_tensor.shape
    n = b * s

    # Tiny preamble: one [N,6] int32 time-major pack (row = t*B + b).
    def tm(a):
        return jnp.transpose(a).reshape(n).astype(jnp.int32)

    rows = jnp.arange(n, dtype=jnp.int32)
    data = jnp.stack([tm(src_tensor), tm(tgt_tensor), tm(src_attn_mask), tm(tgt_mask),
                      rows % b, rows // b], axis=1)                       # [N, 6]

    kernel = functools.partial(_fused_ner_kernel, batch=b, seqlen=s)
    loss = pl.pallas_call(
        kernel,
        out_shape=jax.ShapeDtypeStruct((1, 1), jnp.float32),
    )(data, params["emb_tab"], params["wqkv"], params["wo"], params["w1"],
      params["w2"], params["fc_w"], params["crf"], params["vecs"])
    return loss[0, 0]


# ----------------------------- demo --------------------------------------------
if __name__ == "__main__":
    B, S = 2, 8
    key = jax.random.PRNGKey(0)
    k_src, k_tgt = jax.random.split(key, 2)

    src_tensor = jax.random.randint(k_src, (B, S), 0, VOCAB_SIZE, dtype=jnp.int32)
    src_attn_mask = jnp.array([[1, 1, 1, 1, 1, 1, 1, 1],
                               [1, 1, 1, 1, 1, 1, 0, 0]], dtype=jnp.int32)
    tgt_tensor = jax.random.randint(k_tgt, (B, S), 0, NUM_CLASS, dtype=jnp.int32)
    tgt_mask = src_attn_mask   # first column all ones, left-aligned (torchcrf requirement)

    params = pack_params(init_params(jax.random.PRNGKey(42)))

    loss = jax.jit(ner_forward)(params, src_tensor, src_attn_mask,
                                tgt_tensor, tgt_mask)
    loss = jax.block_until_ready(loss)
    assert jnp.isfinite(loss)
    print("KERNEL_OK")
</pallas_src>

<mosaic_0001>
module attributes {stable_mosaic.version = 11 : i64} {
  func.func @_fused_ner_kernel(%arg0: memref<16x6xi32, #tpu.memory_space<vmem>>, %arg1: memref<133x32xf32, #tpu.memory_space<vmem>>, %arg2: memref<2x32x96xf32, #tpu.memory_space<vmem>>, %arg3: memref<2x32x32xf32, #tpu.memory_space<vmem>>, %arg4: memref<2x32x64xf32, #tpu.memory_space<vmem>>, %arg5: memref<2x64x32xf32, #tpu.memory_space<vmem>>, %arg6: memref<32x8xf32, #tpu.memory_space<vmem>>, %arg7: memref<16x8xf32, #tpu.memory_space<vmem>>, %arg8: memref<24x128xf32, #tpu.memory_space<vmem>>, %arg9: memref<1x1xf32, #tpu.memory_space<vmem>>) attributes {dimension_semantics = [], scalar_prefetch = 0 : i64, scratch_operands = 0 : i64, tpu.core_type = #tpu.core_type<tc>} {
    %c0 = arith.constant 0 : index
    %c0_0 = arith.constant 0 : index
    %0 = vector.load %arg8[%c0, %c0_0] : memref<24x128xf32, #tpu.memory_space<vmem>>, vector<24x128xf32>
    %c0_1 = arith.constant 0 : index
    %c0_2 = arith.constant 0 : index
    %1 = vector.load %arg0[%c0_1, %c0_2] : memref<16x6xi32, #tpu.memory_space<vmem>>, vector<16x6xi32>
    %2 = vector.extract_strided_slice %1 {offsets = [0, 0], sizes = [16, 1], strides = [1, 1]} : vector<16x6xi32> to vector<16x1xi32>
    %3 = vector.extract_strided_slice %1 {offsets = [0, 1], sizes = [16, 1], strides = [1, 1]} : vector<16x6xi32> to vector<16x1xi32>
    %4 = vector.extract_strided_slice %1 {offsets = [0, 2], sizes = [16, 1], strides = [1, 1]} : vector<16x6xi32> to vector<16x1xi32>
    %5 = arith.sitofp %4 : vector<16x1xi32> to vector<16x1xf32>
    %6 = vector.extract_strided_slice %1 {offsets = [0, 3], sizes = [16, 1], strides = [1, 1]} : vector<16x6xi32> to vector<16x1xi32>
    %7 = arith.sitofp %6 : vector<16x1xi32> to vector<16x1xf32>
    %8 = vector.extract_strided_slice %1 {offsets = [0, 4], sizes = [16, 1], strides = [1, 1]} : vector<16x6xi32> to vector<16x1xi32>
    %9 = vector.extract_strided_slice %1 {offsets = [0, 5], sizes = [16, 1], strides = [1, 1]} : vector<16x6xi32> to vector<16x1xi32>
    %10 = tpu.iota {dimensions = array<i32: 1>} : vector<16x133xi32>
    %11 = vector.broadcast %2 : vector<16x1xi32> to vector<16x133xi32>
    %12 = arith.cmpi eq, %10, %11 : vector<16x133xi32>
    %c100_i32 = arith.constant 100 : i32
    %13 = vector.broadcast %c100_i32 : i32 to vector<16x1xi32>
    %14 = arith.addi %9, %13 : vector<16x1xi32>
    %15 = vector.broadcast %14 : vector<16x1xi32> to vector<16x133xi32>
    %16 = arith.cmpi eq, %10, %15 : vector<16x133xi32>
    %17 = arith.ori %12, %16 : vector<16x133xi1>
    %c132_i32 = arith.constant 132 : i32
    %18 = vector.broadcast %c132_i32 : i32 to vector<16x133xi32>
    %19 = arith.cmpi eq, %10, %18 : vector<16x133xi32>
    %20 = arith.ori %17, %19 : vector<16x133xi1>
    %21 = arith.extui %20 : vector<16x133xi1> to vector<16x133xi32>
    %22 = arith.sitofp %21 : vector<16x133xi32> to vector<16x133xf32>
    %c0_3 = arith.constant 0 : index
    %c0_4 = arith.constant 0 : index
    %23 = vector.load %arg1[%c0_3, %c0_4] : memref<133x32xf32, #tpu.memory_space<vmem>>, vector<133x32xf32>
    %cst = arith.constant dense<0.000000e+00> : vector<16x32xf32>
    %24 = tpu.matmul %22, %23, %cst {dimension_numbers = #tpu.dot_dimension_numbers<[1], [0], [0], [1], [0, 0, 1, 1], [], []>} : vector<16x133xf32>, vector<133x32xf32>, vector<16x32xf32> -> vector<16x32xf32>
    %25 = vector.extract_strided_slice %0 {offsets = [0, 0], sizes = [1, 32], strides = [1, 1]} : vector<24x128xf32> to vector<1x32xf32>
    %26 = vector.extract_strided_slice %0 {offsets = [1, 0], sizes = [1, 32], strides = [1, 1]} : vector<24x128xf32> to vector<1x32xf32>
    %cst_5 = arith.constant dense<0.000000e+00> : vector<16xf32>
    %27 = vector.multi_reduction <add>, %24, %cst_5 [1] : vector<16x32xf32> to vector<16xf32>
    %28 = vector.shape_cast %27 : vector<16xf32> to vector<16x1xf32>
    %cst_6 = arith.constant 3.200000e+01 : f32
    %29 = vector.broadcast %cst_6 : f32 to vector<16x1xf32>
    %30 = arith.divf %28, %29 : vector<16x1xf32>
    %31 = vector.broadcast %30 : vector<16x1xf32> to vector<16x32xf32>
    %32 = arith.subf %24, %31 : vector<16x32xf32>
    %33 = arith.mulf %32, %32 : vector<16x32xf32>
    %cst_7 = arith.constant dense<0.000000e+00> : vector<16xf32>
    %34 = vector.multi_reduction <add>, %33, %cst_7 [1] : vector<16x32xf32> to vector<16xf32>
    %35 = vector.shape_cast %34 : vector<16xf32> to vector<16x1xf32>
    %cst_8 = arith.constant 3.200000e+01 : f32
    %36 = vector.broadcast %cst_8 : f32 to vector<16x1xf32>
    %37 = arith.divf %35, %36 : vector<16x1xf32>
    %cst_9 = arith.constant 9.99999996E-13 : f32
    %38 = vector.broadcast %cst_9 : f32 to vector<16x1xf32>
    %39 = arith.addf %37, %38 : vector<16x1xf32>
    %40 = math.rsqrt %39 : vector<16x1xf32>
    %41 = vector.broadcast %40 : vector<16x1xf32> to vector<16x32xf32>
    %42 = arith.mulf %32, %41 : vector<16x32xf32>
    %43 = vector.broadcast %25 : vector<1x32xf32> to vector<16x32xf32>
    %44 = arith.mulf %42, %43 : vector<16x32xf32>
    %45 = vector.broadcast %26 : vector<1x32xf32> to vector<16x32xf32>
    %46 = arith.addf %44, %45 : vector<16x32xf32>
    %47 = tpu.iota {dimensions = array<i32: 1>} : vector<16x2xi32>
    %48 = vector.broadcast %8 : vector<16x1xi32> to vector<16x2xi32>
    %49 = arith.cmpi eq, %47, %48 : vector<16x2xi32>
    %50 = arith.extui %49 : vector<16x2xi1> to vector<16x2xi32>
    %51 = arith.sitofp %50 : vector<16x2xi32> to vector<16x2xf32>
    %52 = vector.broadcast %5 : vector<16x1xf32> to vector<16x2xf32>
    %53 = arith.mulf %51, %52 : vector<16x2xf32>
    %cst_10 = arith.constant dense<0.000000e+00> : vector<16x16xf32>
    %54 = tpu.matmul %51, %53, %cst_10 {dimension_numbers = #tpu.dot_dimension_numbers<[1], [1], [0], [0], [0, 0, 1, 0], [], []>} : vector<16x2xf32>, vector<16x2xf32>, vector<16x16xf32> -> vector<16x16xf32>
    %cst_11 = arith.constant 1.000000e+00 : f32
    %55 = vector.broadcast %cst_11 : f32 to vector<16x16xf32>
    %56 = arith.subf %54, %55 : vector<16x16xf32>
    %cst_12 = arith.constant 1.000000e+09 : f32
    %57 = vector.broadcast %cst_12 : f32 to vector<16x16xf32>
    %58 = arith.mulf %56, %57 : vector<16x16xf32>
    %c0_13 = arith.constant 0 : index
    %c0_14 = arith.constant 0 : index
    %c0_15 = arith.constant 0 : index
    %59 = vector.load %arg2[%c0_13, %c0_14, %c0_15] : memref<2x32x96xf32, #tpu.memory_space<vmem>>, vector<1x32x96xf32>
    %60 = vector.shape_cast %59 : vector<1x32x96xf32> to vector<32x96xf32>
    %cst_16 = arith.constant dense<0.000000e+00> : vector<16x96xf32>
    %61 = tpu.matmul %46, %60, %cst_16 {dimension_numbers = #tpu.dot_dimension_numbers<[1], [0], [0], [1], [0, 0, 1, 1], [], []>} : vector<16x32xf32>, vector<32x96xf32>, vector<16x96xf32> -> vector<16x96xf32>
    %62 = vector.extract_strided_slice %0 {offsets = [2, 0], sizes = [1, 96], strides = [1, 1]} : vector<24x128xf32> to vector<1x96xf32>
    %63 = vector.broadcast %62 : vector<1x96xf32> to vector<16x96xf32>
    %64 = arith.addf %61, %63 : vector<16x96xf32>
    %65 = vector.extract_strided_slice %64 {offsets = [0, 0], sizes = [16, 16], strides = [1, 1]} : vector<16x96xf32> to vector<16x16xf32>
    %66 = vector.extract_strided_slice %64 {offsets = [0, 32], sizes = [16, 16], strides = [1, 1]} : vector<16x96xf32> to vector<16x16xf32>
    %67 = vector.extract_strided_slice %64 {offsets = [0, 64], sizes = [16, 16], strides = [1, 1]} : vector<16x96xf32> to vector<16x16xf32>
    %cst_17 = arith.constant dense<0.000000e+00> : vector<16x16xf32>
    %68 = tpu.matmul %65, %66, %cst_17 {dimension_numbers = #tpu.dot_dimension_numbers<[1], [1], [0], [0], [0, 0, 1, 0], [], []>} : vector<16x16xf32>, vector<16x16xf32>, vector<16x16xf32> -> vector<16x16xf32>
    %cst_18 = arith.constant 2.500000e-01 : f32
    %69 = vector.broadcast %cst_18 : f32 to vector<16x16xf32>
    %70 = arith.mulf %68, %69 : vector<16x16xf32>
    %71 = arith.addf %70, %58 : vector<16x16xf32>
    %cst_19 = arith.constant dense<0xFF800000> : vector<16xf32>
    %72 = vector.multi_reduction <maximumf>, %71, %cst_19 [1] : vector<16x16xf32> to vector<16xf32>
    %73 = vector.shape_cast %72 : vector<16xf32> to vector<16x1xf32>
    %74 = vector.broadcast %73 : vector<16x1xf32> to vector<16x16xf32>
    %75 = arith.subf %71, %74 : vector<16x16xf32>
    %76 = math.exp %75 : vector<16x16xf32>
    %cst_20 = arith.constant dense<0.000000e+00> : vector<16xf32>
    %77 = vector.multi_reduction <add>, %76, %cst_20 [1] : vector<16x16xf32> to vector<16xf32>
    %78 = vector.shape_cast %77 : vector<16xf32> to vector<16x1xf32>
    %79 = tpu.reciprocal %78 {approx = true} : vector<16x1xf32> -> vector<16x1xf32>
    %80 = vector.broadcast %79 : vector<16x1xf32> to vector<16x16xf32>
    %81 = arith.mulf %76, %80 : vector<16x16xf32>
    %cst_21 = arith.constant dense<0.000000e+00> : vector<16x16xf32>
    %82 = tpu.matmul %81, %67, %cst_21 {dimension_numbers = #tpu.dot_dimension_numbers<[1], [0], [0], [1], [0, 0, 1, 1], [], []>} : vector<16x16xf32>, vector<16x16xf32>, vector<16x16xf32> -> vector<16x16xf32>
    %83 = vector.extract_strided_slice %64 {offsets = [0, 16], sizes = [16, 16], strides = [1, 1]} : vector<16x96xf32> to vector<16x16xf32>
    %84 = vector.extract_strided_slice %64 {offsets = [0, 48], sizes = [16, 16], strides = [1, 1]} : vector<16x96xf32> to vector<16x16xf32>
    %85 = vector.extract_strided_slice %64 {offsets = [0, 80], sizes = [16, 16], strides = [1, 1]} : vector<16x96xf32> to vector<16x16xf32>
    %cst_22 = arith.constant dense<0.000000e+00> : vector<16x16xf32>
    %86 = tpu.matmul %83, %84, %cst_22 {dimension_numbers = #tpu.dot_dimension_numbers<[1], [1], [0], [0], [0, 0, 1, 0], [], []>} : vector<16x16xf32>, vector<16x16xf32>, vector<16x16xf32> -> vector<16x16xf32>
    %cst_23 = arith.constant 2.500000e-01 : f32
    %87 = vector.broadcast %cst_23 : f32 to vector<16x16xf32>
    %88 = arith.mulf %86, %87 : vector<16x16xf32>
    %89 = arith.addf %88, %58 : vector<16x16xf32>
    %cst_24 = arith.constant dense<0xFF800000> : vector<16xf32>
    %90 = vector.multi_reduction <maximumf>, %89, %cst_24 [1] : vector<16x16xf32> to vector<16xf32>
    %91 = vector.shape_cast %90 : vector<16xf32> to vector<16x1xf32>
    %92 = vector.broadcast %91 : vector<16x1xf32> to vector<16x16xf32>
    %93 = arith.subf %89, %92 : vector<16x16xf32>
    %94 = math.exp %93 : vector<16x16xf32>
    %cst_25 = arith.constant dense<0.000000e+00> : vector<16xf32>
    %95 = vector.multi_reduction <add>, %94, %cst_25 [1] : vector<16x16xf32> to vector<16xf32>
    %96 = vector.shape_cast %95 : vector<16xf32> to vector<16x1xf32>
    %97 = tpu.reciprocal %96 {approx = true} : vector<16x1xf32> -> vector<16x1xf32>
    %98 = vector.broadcast %97 : vector<16x1xf32> to vector<16x16xf32>
    %99 = arith.mulf %94, %98 : vector<16x16xf32>
    %cst_26 = arith.constant dense<0.000000e+00> : vector<16x16xf32>
    %100 = tpu.matmul %99, %85, %cst_26 {dimension_numbers = #tpu.dot_dimension_numbers<[1], [0], [0], [1], [0, 0, 1, 1], [], []>} : vector<16x16xf32>, vector<16x16xf32>, vector<16x16xf32> -> vector<16x16xf32>
    %101 = tpu.concatenate %82, %100 in 1 : vector<16x16xf32>, vector<16x16xf32> -> vector<16x32xf32>
    %c0_27 = arith.constant 0 : index
    %c0_28 = arith.constant 0 : index
    %c0_29 = arith.constant 0 : index
    %102 = vector.load %arg3[%c0_27, %c0_28, %c0_29] : memref<2x32x32xf32, #tpu.memory_space<vmem>>, vector<1x32x32xf32>
    %103 = vector.shape_cast %102 : vector<1x32x32xf32> to vector<32x32xf32>
    %cst_30 = arith.constant dense<0.000000e+00> : vector<16x32xf32>
    %104 = tpu.matmul %101, %103, %cst_30 {dimension_numbers = #tpu.dot_dimension_numbers<[1], [0], [0], [1], [0, 0, 1, 1], [], []>} : vector<16x32xf32>, vector<32x32xf32>, vector<16x32xf32> -> vector<16x32xf32>
    %105 = vector.extract_strided_slice %0 {offsets = [3, 0], sizes = [1, 32], strides = [1, 1]} : vector<24x128xf32> to vector<1x32xf32>
    %106 = vector.broadcast %105 : vector<1x32xf32> to vector<16x32xf32>
    %107 = arith.addf %104, %106 : vector<16x32xf32>
    %108 = arith.addf %46, %107 : vector<16x32xf32>
    %109 = vector.extract_strided_slice %0 {offsets = [4, 0], sizes = [1, 32], strides = [1, 1]} : vector<24x128xf32> to vector<1x32xf32>
    %110 = vector.extract_strided_slice %0 {offsets = [5, 0], sizes = [1, 32], strides = [1, 1]} : vector<24x128xf32> to vector<1x32xf32>
    %cst_31 = arith.constant dense<0.000000e+00> : vector<16xf32>
    %111 = vector.multi_reduction <add>, %108, %cst_31 [1] : vector<16x32xf32> to vector<16xf32>
    %112 = vector.shape_cast %111 : vector<16xf32> to vector<16x1xf32>
    %cst_32 = arith.constant 3.200000e+01 : f32
    %113 = vector.broadcast %cst_32 : f32 to vector<16x1xf32>
    %114 = arith.divf %112, %113 : vector<16x1xf32>
    %115 = vector.broadcast %114 : vector<16x1xf32> to vector<16x32xf32>
    %116 = arith.subf %108, %115 : vector<16x32xf32>
    %117 = arith.mulf %116, %116 : vector<16x32xf32>
    %cst_33 = arith.constant dense<0.000000e+00> : vector<16xf32>
    %118 = vector.multi_reduction <add>, %117, %cst_33 [1] : vector<16x32xf32> to vector<16xf32>
    %119 = vector.shape_cast %118 : vector<16xf32> to vector<16x1xf32>
    %cst_34 = arith.constant 3.200000e+01 : f32
    %120 = vector.broadcast %cst_34 : f32 to vector<16x1xf32>
    %121 = arith.divf %119, %120 : vector<16x1xf32>
    %cst_35 = arith.constant 9.99999996E-13 : f32
    %122 = vector.broadcast %cst_35 : f32 to vector<16x1xf32>
    %123 = arith.addf %121, %122 : vector<16x1xf32>
    %124 = math.rsqrt %123 : vector<16x1xf32>
    %125 = vector.broadcast %124 : vector<16x1xf32> to vector<16x32xf32>
    %126 = arith.mulf %116, %125 : vector<16x32xf32>
    %127 = vector.broadcast %109 : vector<1x32xf32> to vector<16x32xf32>
    %128 = arith.mulf %126, %127 : vector<16x32xf32>
    %129 = vector.broadcast %110 : vector<1x32xf32> to vector<16x32xf32>
    %130 = arith.addf %128, %129 : vector<16x32xf32>
    %c0_36 = arith.constant 0 : index
    %c0_37 = arith.constant 0 : index
    %c0_38 = arith.constant 0 : index
    %131 = vector.load %arg4[%c0_36, %c0_37, %c0_38] : memref<2x32x64xf32, #tpu.memory_space<vmem>>, vector<1x32x64xf32>
    %132 = vector.shape_cast %131 : vector<1x32x64xf32> to vector<32x64xf32>
    %cst_39 = arith.constant dense<0.000000e+00> : vector<16x64xf32>
    %133 = tpu.matmul %130, %132, %cst_39 {dimension_numbers = #tpu.dot_dimension_numbers<[1], [0], [0], [1], [0, 0, 1, 1], [], []>} : vector<16x32xf32>, vector<32x64xf32>, vector<16x64xf32> -> vector<16x64xf32>
    %134 = vector.extract_strided_slice %0 {offsets = [6, 0], sizes = [1, 64], strides = [1, 1]} : vector<24x128xf32> to vector<1x64xf32>
    %135 = vector.broadcast %134 : vector<1x64xf32> to vector<16x64xf32>
    %136 = arith.addf %133, %135 : vector<16x64xf32>
    %cst_40 = arith.constant 5.000000e-01 : f32
    %137 = vector.broadcast %cst_40 : f32 to vector<16x64xf32>
    %138 = arith.mulf %137, %136 : vector<16x64xf32>
    %cst_41 = arith.constant 4.471500e-02 : f32
    %139 = vector.broadcast %cst_41 : f32 to vector<16x64xf32>
    %140 = arith.mulf %139, %136 : vector<16x64xf32>
    %141 = arith.mulf %140, %136 : vector<16x64xf32>
    %142 = arith.mulf %141, %136 : vector<16x64xf32>
    %143 = arith.addf %136, %142 : vector<16x64xf32>
    %cst_42 = arith.constant 0.797884583 : f32
    %144 = vector.broadcast %cst_42 : f32 to vector<16x64xf32>
    %145 = arith.mulf %144, %143 : vector<16x64xf32>
    %146 = math.tanh %145 : vector<16x64xf32>
    %cst_43 = arith.constant 1.000000e+00 : f32
    %147 = vector.broadcast %cst_43 : f32 to vector<16x64xf32>
    %148 = arith.addf %147, %146 : vector<16x64xf32>
    %149 = arith.mulf %138, %148 : vector<16x64xf32>
    %c0_44 = arith.constant 0 : index
    %c0_45 = arith.constant 0 : index
    %c0_46 = arith.constant 0 : index
    %150 = vector.load %arg5[%c0_44, %c0_45, %c0_46] : memref<2x64x32xf32, #tpu.memory_space<vmem>>, vector<1x64x32xf32>
    %151 = vector.shape_cast %150 : vector<1x64x32xf32> to vector<64x32xf32>
    %cst_47 = arith.constant dense<0.000000e+00> : vector<16x32xf32>
    %152 = tpu.matmul %149, %151, %cst_47 {dimension_numbers = #tpu.dot_dimension_numbers<[1], [0], [0], [1], [0, 0, 1, 1], [], []>} : vector<16x64xf32>, vector<64x32xf32>, vector<16x32xf32> -> vector<16x32xf32>
    %153 = vector.extract_strided_slice %0 {offsets = [7, 0], sizes = [1, 32], strides = [1, 1]} : vector<24x128xf32> to vector<1x32xf32>
    %154 = vector.broadcast %153 : vector<1x32xf32> to vector<16x32xf32>
    %155 = arith.addf %152, %154 : vector<16x32xf32>
    %156 = arith.addf %130, %155 : vector<16x32xf32>
    %157 = vector.extract_strided_slice %0 {offsets = [8, 0], sizes = [1, 32], strides = [1, 1]} : vector<24x128xf32> to vector<1x32xf32>
    %158 = vector.extract_strided_slice %0 {offsets = [9, 0], sizes = [1, 32], strides = [1, 1]} : vector<24x128xf32> to vector<1x32xf32>
    %cst_48 = arith.constant dense<0.000000e+00> : vector<16xf32>
    %159 = vector.multi_reduction <add>, %156, %cst_48 [1] : vector<16x32xf32> to vector<16xf32>
    %160 = vector.shape_cast %159 : vector<16xf32> to vector<16x1xf32>
    %cst_49 = arith.constant 3.200000e+01 : f32
    %161 = vector.broadcast %cst_49 : f32 to vector<16x1xf32>
    %162 = arith.divf %160, %161 : vector<16x1xf32>
    %163 = vector.broadcast %162 : vector<16x1xf32> to vector<16x32xf32>
    %164 = arith.subf %156, %163 : vector<16x32xf32>
    %165 = arith.mulf %164, %164 : vector<16x32xf32>
    %cst_50 = arith.constant dense<0.000000e+00> : vector<16xf32>
    %166 = vector.multi_reduction <add>, %165, %cst_50 [1] : vector<16x32xf32> to vector<16xf32>
    %167 = vector.shape_cast %166 : vector<16xf32> to vector<16x1xf32>
    %cst_51 = arith.constant 3.200000e+01 : f32
    %168 = vector.broadcast %cst_51 : f32 to vector<16x1xf32>
    %169 = arith.divf %167, %168 : vector<16x1xf32>
    %cst_52 = arith.constant 9.99999996E-13 : f32
    %170 = vector.broadcast %cst_52 : f32 to vector<16x1xf32>
    %171 = arith.addf %169, %170 : vector<16x1xf32>
    %172 = math.rsqrt %171 : vector<16x1xf32>
    %173 = vector.broadcast %172 : vector<16x1xf32> to vector<16x32xf32>
    %174 = arith.mulf %164, %173 : vector<16x32xf32>
    %175 = vector.broadcast %157 : vector<1x32xf32> to vector<16x32xf32>
    %176 = arith.mulf %174, %175 : vector<16x32xf32>
    %177 = vector.broadcast %158 : vector<1x32xf32> to vector<16x32xf32>
    %178 = arith.addf %176, %177 : vector<16x32xf32>
    %c1 = arith.constant 1 : index
    %c0_53 = arith.constant 0 : index
    %c0_54 = arith.constant 0 : index
    %179 = vector.load %arg2[%c1, %c0_53, %c0_54] : memref<2x32x96xf32, #tpu.memory_space<vmem>>, vector<1x32x96xf32>
    %180 = vector.shape_cast %179 : vector<1x32x96xf32> to vector<32x96xf32>
    %cst_55 = arith.constant dense<0.000000e+00> : vector<16x96xf32>
    %181 = tpu.matmul %178, %180, %cst_55 {dimension_numbers = #tpu.dot_dimension_numbers<[1], [0], [0], [1], [0, 0, 1, 1], [], []>} : vector<16x32xf32>, vector<32x96xf32>, vector<16x96xf32> -> vector<16x96xf32>
    %182 = vector.extract_strided_slice %0 {offsets = [10, 0], sizes = [1, 96], strides = [1, 1]} : vector<24x128xf32> to vector<1x96xf32>
    %183 = vector.broadcast %182 : vector<1x96xf32> to vector<16x96xf32>
    %184 = arith.addf %181, %183 : vector<16x96xf32>
    %185 = vector.extract_strided_slice %184 {offsets = [0, 0], sizes = [16, 16], strides = [1, 1]} : vector<16x96xf32> to vector<16x16xf32>
    %186 = vector.extract_strided_slice %184 {offsets = [0, 32], sizes = [16, 16], strides = [1, 1]} : vector<16x96xf32> to vector<16x16xf32>
    %187 = vector.extract_strided_slice %184 {offsets = [0, 64], sizes = [16, 16], strides = [1, 1]} : vector<16x96xf32> to vector<16x16xf32>
    %cst_56 = arith.constant dense<0.000000e+00> : vector<16x16xf32>
    %188 = tpu.matmul %185, %186, %cst_56 {dimension_numbers = #tpu.dot_dimension_numbers<[1], [1], [0], [0], [0, 0, 1, 0], [], []>} : vector<16x16xf32>, vector<16x16xf32>, vector<16x16xf32> -> vector<16x16xf32>
    %cst_57 = arith.constant 2.500000e-01 : f32
    %189 = vector.broadcast %cst_57 : f32 to vector<16x16xf32>
    %190 = arith.mulf %188, %189 : vector<16x16xf32>
    %191 = arith.addf %190, %58 : vector<16x16xf32>
    %cst_58 = arith.constant dense<0xFF800000> : vector<16xf32>
    %192 = vector.multi_reduction <maximumf>, %191, %cst_58 [1] : vector<16x16xf32> to vector<16xf32>
    %193 = vector.shape_cast %192 : vector<16xf32> to vector<16x1xf32>
    %194 = vector.broadcast %193 : vector<16x1xf32> to vector<16x16xf32>
    %195 = arith.subf %191, %194 : vector<16x16xf32>
    %196 = math.exp %195 : vector<16x16xf32>
    %cst_59 = arith.constant dense<0.000000e+00> : vector<16xf32>
    %197 = vector.multi_reduction <add>, %196, %cst_59 [1] : vector<16x16xf32> to vector<16xf32>
    %198 = vector.shape_cast %197 : vector<16xf32> to vector<16x1xf32>
    %199 = tpu.reciprocal %198 {approx = true} : vector<16x1xf32> -> vector<16x1xf32>
    %200 = vector.broadcast %199 : vector<16x1xf32> to vector<16x16xf32>
    %201 = arith.mulf %196, %200 : vector<16x16xf32>
    %cst_60 = arith.constant dense<0.000000e+00> : vector<16x16xf32>
    %202 = tpu.matmul %201, %187, %cst_60 {dimension_numbers = #tpu.dot_dimension_numbers<[1], [0], [0], [1], [0, 0, 1, 1], [], []>} : vector<16x16xf32>, vector<16x16xf32>, vector<16x16xf32> -> vector<16x16xf32>
    %203 = vector.extract_strided_slice %184 {offsets = [0, 16], sizes = [16, 16], strides = [1, 1]} : vector<16x96xf32> to vector<16x16xf32>
    %204 = vector.extract_strided_slice %184 {offsets = [0, 48], sizes = [16, 16], strides = [1, 1]} : vector<16x96xf32> to vector<16x16xf32>
    %205 = vector.extract_strided_slice %184 {offsets = [0, 80], sizes = [16, 16], strides = [1, 1]} : vector<16x96xf32> to vector<16x16xf32>
    %cst_61 = arith.constant dense<0.000000e+00> : vector<16x16xf32>
    %206 = tpu.matmul %203, %204, %cst_61 {dimension_numbers = #tpu.dot_dimension_numbers<[1], [1], [0], [0], [0, 0, 1, 0], [], []>} : vector<16x16xf32>, vector<16x16xf32>, vector<16x16xf32> -> vector<16x16xf32>
    %cst_62 = arith.constant 2.500000e-01 : f32
    %207 = vector.broadcast %cst_62 : f32 to vector<16x16xf32>
    %208 = arith.mulf %206, %207 : vector<16x16xf32>
    %209 = arith.addf %208, %58 : vector<16x16xf32>
    %cst_63 = arith.constant dense<0xFF800000> : vector<16xf32>
    %210 = vector.multi_reduction <maximumf>, %209, %cst_63 [1] : vector<16x16xf32> to vector<16xf32>
    %211 = vector.shape_cast %210 : vector<16xf32> to vector<16x1xf32>
    %212 = vector.broadcast %211 : vector<16x1xf32> to vector<16x16xf32>
    %213 = arith.subf %209, %212 : vector<16x16xf32>
    %214 = math.exp %213 : vector<16x16xf32>
    %cst_64 = arith.constant dense<0.000000e+00> : vector<16xf32>
    %215 = vector.multi_reduction <add>, %214, %cst_64 [1] : vector<16x16xf32> to vector<16xf32>
    %216 = vector.shape_cast %215 : vector<16xf32> to vector<16x1xf32>
    %217 = tpu.reciprocal %216 {approx = true} : vector<16x1xf32> -> vector<16x1xf32>
    %218 = vector.broadcast %217 : vector<16x1xf32> to vector<16x16xf32>
    %219 = arith.mulf %214, %218 : vector<16x16xf32>
    %cst_65 = arith.constant dense<0.000000e+00> : vector<16x16xf32>
    %220 = tpu.matmul %219, %205, %cst_65 {dimension_numbers = #tpu.dot_dimension_numbers<[1], [0], [0], [1], [0, 0, 1, 1], [], []>} : vector<16x16xf32>, vector<16x16xf32>, vector<16x16xf32> -> vector<16x16xf32>
    %221 = tpu.concatenate %202, %220 in 1 : vector<16x16xf32>, vector<16x16xf32> -> vector<16x32xf32>
    %c1_66 = arith.constant 1 : index
    %c0_67 = arith.constant 0 : index
    %c0_68 = arith.constant 0 : index
    %222 = vector.load %arg3[%c1_66, %c0_67, %c0_68] : memref<2x32x32xf32, #tpu.memory_space<vmem>>, vector<1x32x32xf32>
    %223 = vector.shape_cast %222 : vector<1x32x32xf32> to vector<32x32xf32>
    %cst_69 = arith.constant dense<0.000000e+00> : vector<16x32xf32>
    %224 = tpu.matmul %221, %223, %cst_69 {dimension_numbers = #tpu.dot_dimension_numbers<[1], [0], [0], [1], [0, 0, 1, 1], [], []>} : vector<16x32xf32>, vector<32x32xf32>, vector<16x32xf32> -> vector<16x32xf32>
    %225 = vector.extract_strided_slice %0 {offsets = [11, 0], sizes = [1, 32], strides = [1, 1]} : vector<24x128xf32> to vector<1x32xf32>
    %226 = vector.broadcast %225 : vector<1x32xf32> to vector<16x32xf32>
    %227 = arith.addf %224, %226 : vector<16x32xf32>
    %228 = arith.addf %178, %227 : vector<16x32xf32>
    %229 = vector.extract_strided_slice %0 {offsets = [12, 0], sizes = [1, 32], strides = [1, 1]} : vector<24x128xf32> to vector<1x32xf32>
    %230 = vector.extract_strided_slice %0 {offsets = [13, 0], sizes = [1, 32], strides = [1, 1]} : vector<24x128xf32> to vector<1x32xf32>
    %cst_70 = arith.constant dense<0.000000e+00> : vector<16xf32>
    %231 = vector.multi_reduction <add>, %228, %cst_70 [1] : vector<16x32xf32> to vector<16xf32>
    %232 = vector.shape_cast %231 : vector<16xf32> to vector<16x1xf32>
    %cst_71 = arith.constant 3.200000e+01 : f32
    %233 = vector.broadcast %cst_71 : f32 to vector<16x1xf32>
    %234 = arith.divf %232, %233 : vector<16x1xf32>
    %235 = vector.broadcast %234 : vector<16x1xf32> to vector<16x32xf32>
    %236 = arith.subf %228, %235 : vector<16x32xf32>
    %237 = arith.mulf %236, %236 : vector<16x32xf32>
    %cst_72 = arith.constant dense<0.000000e+00> : vector<16xf32>
    %238 = vector.multi_reduction <add>, %237, %cst_72 [1] : vector<16x32xf32> to vector<16xf32>
    %239 = vector.shape_cast %238 : vector<16xf32> to vector<16x1xf32>
    %cst_73 = arith.constant 3.200000e+01 : f32
    %240 = vector.broadcast %cst_73 : f32 to vector<16x1xf32>
    %241 = arith.divf %239, %240 : vector<16x1xf32>
    %cst_74 = arith.constant 9.99999996E-13 : f32
    %242 = vector.broadcast %cst_74 : f32 to vector<16x1xf32>
    %243 = arith.addf %241, %242 : vector<16x1xf32>
    %244 = math.rsqrt %243 : vector<16x1xf32>
    %245 = vector.broadcast %244 : vector<16x1xf32> to vector<16x32xf32>
    %246 = arith.mulf %236, %245 : vector<16x32xf32>
    %247 = vector.broadcast %229 : vector<1x32xf32> to vector<16x32xf32>
    %248 = arith.mulf %246, %247 : vector<16x32xf32>
    %249 = vector.broadcast %230 : vector<1x32xf32> to vector<16x32xf32>
    %250 = arith.addf %248, %249 : vector<16x32xf32>
    %c1_75 = arith.constant 1 : index
    %c0_76 = arith.constant 0 : index
    %c0_77 = arith.constant 0 : index
    %251 = vector.load %arg4[%c1_75, %c0_76, %c0_77] : memref<2x32x64xf32, #tpu.memory_space<vmem>>, vector<1x32x64xf32>
    %252 = vector.shape_cast %251 : vector<1x32x64xf32> to vector<32x64xf32>
    %cst_78 = arith.constant dense<0.000000e+00> : vector<16x64xf32>
    %253 = tpu.matmul %250, %252, %cst_78 {dimension_numbers = #tpu.dot_dimension_numbers<[1], [0], [0], [1], [0, 0, 1, 1], [], []>} : vector<16x32xf32>, vector<32x64xf32>, vector<16x64xf32> -> vector<16x64xf32>
    %254 = vector.extract_strided_slice %0 {offsets = [14, 0], sizes = [1, 64], strides = [1, 1]} : vector<24x128xf32> to vector<1x64xf32>
    %255 = vector.broadcast %254 : vector<1x64xf32> to vector<16x64xf32>
    %256 = arith.addf %253, %255 : vector<16x64xf32>
    %cst_79 = arith.constant 5.000000e-01 : f32
    %257 = vector.broadcast %cst_79 : f32 to vector<16x64xf32>
    %258 = arith.mulf %257, %256 : vector<16x64xf32>
    %cst_80 = arith.constant 4.471500e-02 : f32
    %259 = vector.broadcast %cst_80 : f32 to vector<16x64xf32>
    %260 = arith.mulf %259, %256 : vector<16x64xf32>
    %261 = arith.mulf %260, %256 : vector<16x64xf32>
    %262 = arith.mulf %261, %256 : vector<16x64xf32>
    %263 = arith.addf %256, %262 : vector<16x64xf32>
    %cst_81 = arith.constant 0.797884583 : f32
    %264 = vector.broadcast %cst_81 : f32 to vector<16x64xf32>
    %265 = arith.mulf %264, %263 : vector<16x64xf32>
    %266 = math.tanh %265 : vector<16x64xf32>
    %cst_82 = arith.constant 1.000000e+00 : f32
    %267 = vector.broadcast %cst_82 : f32 to vector<16x64xf32>
    %268 = arith.addf %267, %266 : vector<16x64xf32>
    %269 = arith.mulf %258, %268 : vector<16x64xf32>
    %c1_83 = arith.constant 1 : index
    %c0_84 = arith.constant 0 : index
    %c0_85 = arith.constant 0 : index
    %270 = vector.load %arg5[%c1_83, %c0_84, %c0_85] : memref<2x64x32xf32, #tpu.memory_space<vmem>>, vector<1x64x32xf32>
    %271 = vector.shape_cast %270 : vector<1x64x32xf32> to vector<64x32xf32>
    %cst_86 = arith.constant dense<0.000000e+00> : vector<16x32xf32>
    %272 = tpu.matmul %269, %271, %cst_86 {dimension_numbers = #tpu.dot_dimension_numbers<[1], [0], [0], [1], [0, 0, 1, 1], [], []>} : vector<16x64xf32>, vector<64x32xf32>, vector<16x32xf32> -> vector<16x32xf32>
    %273 = vector.extract_strided_slice %0 {offsets = [15, 0], sizes = [1, 32], strides = [1, 1]} : vector<24x128xf32> to vector<1x32xf32>
    %274 = vector.broadcast %273 : vector<1x32xf32> to vector<16x32xf32>
    %275 = arith.addf %272, %274 : vector<16x32xf32>
    %276 = arith.addf %250, %275 : vector<16x32xf32>
    %277 = vector.extract_strided_slice %0 {offsets = [16, 0], sizes = [1, 32], strides = [1, 1]} : vector<24x128xf32> to vector<1x32xf32>
    %278 = vector.extract_strided_slice %0 {offsets = [17, 0], sizes = [1, 32], strides = [1, 1]} : vector<24x128xf32> to vector<1x32xf32>
    %cst_87 = arith.constant dense<0.000000e+00> : vector<16xf32>
    %279 = vector.multi_reduction <add>, %276, %cst_87 [1] : vector<16x32xf32> to vector<16xf32>
    %280 = vector.shape_cast %279 : vector<16xf32> to vector<16x1xf32>
    %cst_88 = arith.constant 3.200000e+01 : f32
    %281 = vector.broadcast %cst_88 : f32 to vector<16x1xf32>
    %282 = arith.divf %280, %281 : vector<16x1xf32>
    %283 = vector.broadcast %282 : vector<16x1xf32> to vector<16x32xf32>
    %284 = arith.subf %276, %283 : vector<16x32xf32>
    %285 = arith.mulf %284, %284 : vector<16x32xf32>
    %cst_89 = arith.constant dense<0.000000e+00> : vector<16xf32>
    %286 = vector.multi_reduction <add>, %285, %cst_89 [1] : vector<16x32xf32> to vector<16xf32>
    %287 = vector.shape_cast %286 : vector<16xf32> to vector<16x1xf32>
    %cst_90 = arith.constant 3.200000e+01 : f32
    %288 = vector.broadcast %cst_90 : f32 to vector<16x1xf32>
    %289 = arith.divf %287, %288 : vector<16x1xf32>
    %cst_91 = arith.constant 9.99999996E-13 : f32
    %290 = vector.broadcast %cst_91 : f32 to vector<16x1xf32>
    %291 = arith.addf %289, %290 : vector<16x1xf32>
    %292 = math.rsqrt %291 : vector<16x1xf32>
    %293 = vector.broadcast %292 : vector<16x1xf32> to vector<16x32xf32>
    %294 = arith.mulf %284, %293 : vector<16x32xf32>
    %295 = vector.broadcast %277 : vector<1x32xf32> to vector<16x32xf32>
    %296 = arith.mulf %294, %295 : vector<16x32xf32>
    %297 = vector.broadcast %278 : vector<1x32xf32> to vector<16x32xf32>
    %298 = arith.addf %296, %297 : vector<16x32xf32>
    %c0_92 = arith.constant 0 : index
    %c0_93 = arith.constant 0 : index
    %299 = vector.load %arg6[%c0_92, %c0_93] : memref<32x8xf32, #tpu.memory_space<vmem>>, vector<32x8xf32>
    %cst_94 = arith.constant dense<0.000000e+00> : vector<16x8xf32>
    %300 = tpu.matmul %298, %299, %cst_94 {dimension_numbers = #tpu.dot_dimension_numbers<[1], [0], [0], [1], [0, 0, 1, 1], [], []>} : vector<16x32xf32>, vector<32x8xf32>, vector<16x8xf32> -> vector<16x8xf32>
    %301 = vector.extract_strided_slice %0 {offsets = [18, 0], sizes = [1, 8], strides = [1, 1]} : vector<24x128xf32> to vector<1x8xf32>
    %302 = vector.broadcast %301 : vector<1x8xf32> to vector<16x8xf32>
    %303 = arith.addf %300, %302 : vector<16x8xf32>
    %c0_95 = arith.constant 0 : index
    %c0_96 = arith.constant 0 : index
    %304 = vector.load %arg7[%c0_95, %c0_96] : memref<16x8xf32, #tpu.memory_space<vmem>>, vector<8x8xf32>
    %c8 = arith.constant 8 : index
    %c0_97 = arith.constant 0 : index
    %305 = vector.load %arg7[%c8, %c0_97] : memref<16x8xf32, #tpu.memory_space<vmem>>, vector<8x8xf32>
    %306 = vector.extract_strided_slice %0 {offsets = [21, 0], sizes = [1, 8], strides = [1, 1]} : vector<24x128xf32> to vector<1x8xf32>
    %307 = vector.extract_strided_slice %0 {offsets = [19, 0], sizes = [1, 8], strides = [1, 1]} : vector<24x128xf32> to vector<1x8xf32>
    %308 = vector.extract_strided_slice %0 {offsets = [20, 0], sizes = [1, 8], strides = [1, 1]} : vector<24x128xf32> to vector<1x8xf32>
    %309 = tpu.iota {dimensions = array<i32: 1>} : vector<16x8xi32>
    %310 = vector.broadcast %3 : vector<16x1xi32> to vector<16x8xi32>
    %311 = arith.cmpi eq, %309, %310 : vector<16x8xi32>
    %312 = arith.extui %311 : vector<16x8xi1> to vector<16x8xi32>
    %313 = arith.sitofp %312 : vector<16x8xi32> to vector<16x8xf32>
    %314 = vector.extract_strided_slice %303 {offsets = [0, 0], sizes = [2, 8], strides = [1, 1]} : vector<16x8xf32> to vector<2x8xf32>
    %315 = vector.extract_strided_slice %313 {offsets = [0, 0], sizes = [2, 8], strides = [1, 1]} : vector<16x8xf32> to vector<2x8xf32>
    %316 = vector.broadcast %307 : vector<1x8xf32> to vector<2x8xf32>
    %317 = arith.addf %316, %314 : vector<2x8xf32>
    %318 = arith.mulf %317, %315 : vector<2x8xf32>
    %319 = vector.shape_cast %318 : vector<2x8xf32> to vector<1x2x8xf32>
    %cst_98 = arith.constant dense<0.000000e+00> : vector<1xf32>
    %320 = vector.multi_reduction <add>, %319, %cst_98 [1, 2] : vector<1x2x8xf32> to vector<1xf32>
    %321 = vector.shape_cast %320 : vector<1xf32> to vector<1x1x1xf32>
    %322 = vector.extract %321[0, 0, 0] : f32 from vector<1x1x1xf32>
    %323 = vector.extract_strided_slice %313 {offsets = [0, 0], sizes = [14, 8], strides = [1, 1]} : vector<16x8xf32> to vector<14x8xf32>
    %cst_99 = arith.constant dense<0.000000e+00> : vector<14x8xf32>
    %324 = tpu.matmul %323, %304, %cst_99 {dimension_numbers = #tpu.dot_dimension_numbers<[1], [0], [0], [1], [0, 0, 1, 1], [], []>} : vector<14x8xf32>, vector<8x8xf32>, vector<14x8xf32> -> vector<14x8xf32>
    %325 = vector.extract_strided_slice %7 {offsets = [2, 0], sizes = [14, 1], strides = [1, 1]} : vector<16x1xf32> to vector<14x1xf32>
    %326 = vector.extract_strided_slice %303 {offsets = [2, 0], sizes = [14, 8], strides = [1, 1]} : vector<16x8xf32> to vector<14x8xf32>
    %327 = arith.addf %324, %326 : vector<14x8xf32>
    %328 = vector.extract_strided_slice %313 {offsets = [2, 0], sizes = [14, 8], strides = [1, 1]} : vector<16x8xf32> to vector<14x8xf32>
    %329 = arith.mulf %327, %328 : vector<14x8xf32>
    %cst_100 = arith.constant dense<0.000000e+00> : vector<14xf32>
    %330 = vector.multi_reduction <add>, %329, %cst_100 [1] : vector<14x8xf32> to vector<14xf32>
    %331 = vector.shape_cast %330 : vector<14xf32> to vector<14x1xf32>
    %332 = arith.mulf %325, %331 : vector<14x1xf32>
    %333 = vector.shape_cast %332 : vector<14x1xf32> to vector<1x14x1xf32>
    %cst_101 = arith.constant dense<0.000000e+00> : vector<1xf32>
    %334 = vector.multi_reduction <add>, %333, %cst_101 [1, 2] : vector<1x14x1xf32> to vector<1xf32>
    %335 = vector.shape_cast %334 : vector<1xf32> to vector<1x1x1xf32>
    %336 = vector.extract %335[0, 0, 0] : f32 from vector<1x1x1xf32>
    %337 = arith.addf %322, %336 : f32
    %338 = vector.broadcast %308 : vector<1x8xf32> to vector<16x8xf32>
    %339 = arith.mulf %313, %338 : vector<16x8xf32>
    %cst_102 = arith.constant dense<0.000000e+00> : vector<16xf32>
    %340 = vector.multi_reduction <add>, %339, %cst_102 [1] : vector<16x8xf32> to vector<16xf32>
    %341 = vector.shape_cast %340 : vector<16xf32> to vector<16x1xf32>
    %342 = vector.extract_strided_slice %7 {offsets = [0, 0], sizes = [14, 1], strides = [1, 1]} : vector<16x1xf32> to vector<14x1xf32>
    %343 = vector.extract_strided_slice %7 {offsets = [2, 0], sizes = [14, 1], strides = [1, 1]} : vector<16x1xf32> to vector<14x1xf32>
    %cst_103 = arith.constant 1.000000e+00 : f32
    %344 = vector.broadcast %cst_103 : f32 to vector<14x1xf32>
    %345 = arith.subf %344, %343 : vector<14x1xf32>
    %346 = arith.mulf %342, %345 : vector<14x1xf32>
    %347 = vector.extract_strided_slice %341 {offsets = [0, 0], sizes = [14, 1], strides = [1, 1]} : vector<16x1xf32> to vector<14x1xf32>
    %348 = arith.mulf %346, %347 : vector<14x1xf32>
    %349 = vector.shape_cast %348 : vector<14x1xf32> to vector<1x14x1xf32>
    %cst_104 = arith.constant dense<0.000000e+00> : vector<1xf32>
    %350 = vector.multi_reduction <add>, %349, %cst_104 [1, 2] : vector<1x14x1xf32> to vector<1xf32>
    %351 = vector.shape_cast %350 : vector<1xf32> to vector<1x1x1xf32>
    %352 = vector.extract %351[0, 0, 0] : f32 from vector<1x1x1xf32>
    %353 = arith.addf %337, %352 : f32
    %354 = vector.extract_strided_slice %7 {offsets = [14, 0], sizes = [2, 1], strides = [1, 1]} : vector<16x1xf32> to vector<2x1xf32>
    %355 = vector.extract_strided_slice %341 {offsets = [14, 0], sizes = [2, 1], strides = [1, 1]} : vector<16x1xf32> to vector<2x1xf32>
    %356 = arith.mulf %354, %355 : vector<2x1xf32>
    %357 = vector.shape_cast %356 : vector<2x1xf32> to vector<1x2x1xf32>
    %cst_105 = arith.constant dense<0.000000e+00> : vector<1xf32>
    %358 = vector.multi_reduction <add>, %357, %cst_105 [1, 2] : vector<1x2x1xf32> to vector<1xf32>
    %359 = vector.shape_cast %358 : vector<1xf32> to vector<1x1x1xf32>
    %360 = vector.extract %359[0, 0, 0] : f32 from vector<1x1x1xf32>
    %361 = arith.addf %353, %360 : f32
    %362 = vector.broadcast %307 : vector<1x8xf32> to vector<2x8xf32>
    %363 = arith.addf %362, %314 : vector<2x8xf32>
    %cst_106 = arith.constant dense<0xFF800000> : vector<2xf32>
    %364 = vector.multi_reduction <maximumf>, %363, %cst_106 [1] : vector<2x8xf32> to vector<2xf32>
    %365 = vector.shape_cast %364 : vector<2xf32> to vector<2x1xf32>
    %366 = vector.broadcast %365 : vector<2x1xf32> to vector<2x8xf32>
    %367 = arith.subf %363, %366 : vector<2x8xf32>
    %368 = math.exp %367 : vector<2x8xf32>
    %369 = vector.broadcast %365 : vector<2x1xf32> to vector<2x8xf32>
    %370 = vector.broadcast %306 : vector<1x8xf32> to vector<2x8xf32>
    %371 = arith.addf %369, %370 : vector<2x8xf32>
    %cst_107 = arith.constant dense<0.000000e+00> : vector<2x8xf32>
    %372 = tpu.matmul %368, %305, %cst_107 {dimension_numbers = #tpu.dot_dimension_numbers<[1], [0], [0], [1], [0, 0, 1, 1], [], []>} : vector<2x8xf32>, vector<8x8xf32>, vector<2x8xf32> -> vector<2x8xf32>
    %373 = math.log %372 : vector<2x8xf32>
    %374 = arith.addf %371, %373 : vector<2x8xf32>
    %375 = vector.extract_strided_slice %303 {offsets = [2, 0], sizes = [2, 8], strides = [1, 1]} : vector<16x8xf32> to vector<2x8xf32>
    %376 = arith.addf %374, %375 : vector<2x8xf32>
    %377 = vector.extract_strided_slice %7 {offsets = [2, 0], sizes = [2, 1], strides = [1, 1]} : vector<16x1xf32> to vector<2x1xf32>
    %cst_108 = arith.constant 0.000000e+00 : f32
    %378 = vector.broadcast %cst_108 : f32 to vector<2x1xf32>
    %379 = arith.cmpf ogt, %377, %378 : vector<2x1xf32>
    %380 = vector.shape_cast %379 : vector<2x1xi1> to vector<2x1xi1>
    %381 = vector.broadcast %380 : vector<2x1xi1> to vector<2x8xi1>
    %382 = arith.select %381, %376, %363 : vector<2x8xi1>, vector<2x8xf32>
    %cst_109 = arith.constant dense<0xFF800000> : vector<2xf32>
    %383 = vector.multi_reduction <maximumf>, %382, %cst_109 [1] : vector<2x8xf32> to vector<2xf32>
    %384 = vector.shape_cast %383 : vector<2xf32> to vector<2x1xf32>
    %385 = vector.broadcast %384 : vector<2x1xf32> to vector<2x8xf32>
    %386 = arith.subf %382, %385 : vector<2x8xf32>
    %387 = math.exp %386 : vector<2x8xf32>
    %388 = vector.broadcast %384 : vector<2x1xf32> to vector<2x8xf32>
    %389 = vector.broadcast %306 : vector<1x8xf32> to vector<2x8xf32>
    %390 = arith.addf %388, %389 : vector<2x8xf32>
    %cst_110 = arith.constant dense<0.000000e+00> : vector<2x8xf32>
    %391 = tpu.matmul %387, %305, %cst_110 {dimension_numbers = #tpu.dot_dimension_numbers<[1], [0], [0], [1], [0, 0, 1, 1], [], []>} : vector<2x8xf32>, vector<8x8xf32>, vector<2x8xf32> -> vector<2x8xf32>
    %392 = math.log %391 : vector<2x8xf32>
    %393 = arith.addf %390, %392 : vector<2x8xf32>
    %394 = vector.extract_strided_slice %303 {offsets = [4, 0], sizes = [2, 8], strides = [1, 1]} : vector<16x8xf32> to vector<2x8xf32>
    %395 = arith.addf %393, %394 : vector<2x8xf32>
    %396 = vector.extract_strided_slice %7 {offsets = [4, 0], sizes = [2, 1], strides = [1, 1]} : vector<16x1xf32> to vector<2x1xf32>
    %cst_111 = arith.constant 0.000000e+00 : f32
    %397 = vector.broadcast %cst_111 : f32 to vector<2x1xf32>
    %398 = arith.cmpf ogt, %396, %397 : vector<2x1xf32>
    %399 = vector.shape_cast %398 : vector<2x1xi1> to vector<2x1xi1>
    %400 = vector.broadcast %399 : vector<2x1xi1> to vector<2x8xi1>
    %401 = arith.select %400, %395, %382 : vector<2x8xi1>, vector<2x8xf32>
    %cst_112 = arith.constant dense<0xFF800000> : vector<2xf32>
    %402 = vector.multi_reduction <maximumf>, %401, %cst_112 [1] : vector<2x8xf32> to vector<2xf32>
    %403 = vector.shape_cast %402 : vector<2xf32> to vector<2x1xf32>
    %404 = vector.broadcast %403 : vector<2x1xf32> to vector<2x8xf32>
    %405 = arith.subf %401, %404 : vector<2x8xf32>
    %406 = math.exp %405 : vector<2x8xf32>
    %407 = vector.broadcast %403 : vector<2x1xf32> to vector<2x8xf32>
    %408 = vector.broadcast %306 : vector<1x8xf32> to vector<2x8xf32>
    %409 = arith.addf %407, %408 : vector<2x8xf32>
    %cst_113 = arith.constant dense<0.000000e+00> : vector<2x8xf32>
    %410 = tpu.matmul %406, %305, %cst_113 {dimension_numbers = #tpu.dot_dimension_numbers<[1], [0], [0], [1], [0, 0, 1, 1], [], []>} : vector<2x8xf32>, vector<8x8xf32>, vector<2x8xf32> -> vector<2x8xf32>
    %411 = math.log %410 : vector<2x8xf32>
    %412 = arith.addf %409, %411 : vector<2x8xf32>
    %413 = vector.extract_strided_slice %303 {offsets = [6, 0], sizes = [2, 8], strides = [1, 1]} : vector<16x8xf32> to vector<2x8xf32>
    %414 = arith.addf %412, %413 : vector<2x8xf32>
    %415 = vector.extract_strided_slice %7 {offsets = [6, 0], sizes = [2, 1], strides = [1, 1]} : vector<16x1xf32> to vector<2x1xf32>
    %cst_114 = arith.constant 0.000000e+00 : f32
    %416 = vector.broadcast %cst_114 : f32 to vector<2x1xf32>
    %417 = arith.cmpf ogt, %415, %416 : vector<2x1xf32>
    %418 = vector.shape_cast %417 : vector<2x1xi1> to vector<2x1xi1>
    %419 = vector.broadcast %418 : vector<2x1xi1> to vector<2x8xi1>
    %420 = arith.select %419, %414, %401 : vector<2x8xi1>, vector<2x8xf32>
    %cst_115 = arith.constant dense<0xFF800000> : vector<2xf32>
    %421 = vector.multi_reduction <maximumf>, %420, %cst_115 [1] : vector<2x8xf32> to vector<2xf32>
    %422 = vector.shape_cast %421 : vector<2xf32> to vector<2x1xf32>
    %423 = vector.broadcast %422 : vector<2x1xf32> to vector<2x8xf32>
    %424 = arith.subf %420, %423 : vector<2x8xf32>
    %425 = math.exp %424 : vector<2x8xf32>
    %426 = vector.broadcast %422 : vector<2x1xf32> to vector<2x8xf32>
    %427 = vector.broadcast %306 : vector<1x8xf32> to vector<2x8xf32>
    %428 = arith.addf %426, %427 : vector<2x8xf32>
    %cst_116 = arith.constant dense<0.000000e+00> : vector<2x8xf32>
    %429 = tpu.matmul %425, %305, %cst_116 {dimension_numbers = #tpu.dot_dimension_numbers<[1], [0], [0], [1], [0, 0, 1, 1], [], []>} : vector<2x8xf32>, vector<8x8xf32>, vector<2x8xf32> -> vector<2x8xf32>
    %430 = math.log %429 : vector<2x8xf32>
    %431 = arith.addf %428, %430 : vector<2x8xf32>
    %432 = vector.extract_strided_slice %303 {offsets = [8, 0], sizes = [2, 8], strides = [1, 1]} : vector<16x8xf32> to vector<2x8xf32>
    %433 = arith.addf %431, %432 : vector<2x8xf32>
    %434 = vector.extract_strided_slice %7 {offsets = [8, 0], sizes = [2, 1], strides = [1, 1]} : vector<16x1xf32> to vector<2x1xf32>
    %cst_117 = arith.constant 0.000000e+00 : f32
    %435 = vector.broadcast %cst_117 : f32 to vector<2x1xf32>
    %436 = arith.cmpf ogt, %434, %435 : vector<2x1xf32>
    %437 = vector.shape_cast %436 : vector<2x1xi1> to vector<2x1xi1>
    %438 = vector.broadcast %437 : vector<2x1xi1> to vector<2x8xi1>
    %439 = arith.select %438, %433, %420 : vector<2x8xi1>, vector<2x8xf32>
    %cst_118 = arith.constant dense<0xFF800000> : vector<2xf32>
    %440 = vector.multi_reduction <maximumf>, %439, %cst_118 [1] : vector<2x8xf32> to vector<2xf32>
    %441 = vector.shape_cast %440 : vector<2xf32> to vector<2x1xf32>
    %442 = vector.broadcast %441 : vector<2x1xf32> to vector<2x8xf32>
    %443 = arith.subf %439, %442 : vector<2x8xf32>
    %444 = math.exp %443 : vector<2x8xf32>
    %445 = vector.broadcast %441 : vector<2x1xf32> to vector<2x8xf32>
    %446 = vector.broadcast %306 : vector<1x8xf32> to vector<2x8xf32>
    %447 = arith.addf %445, %446 : vector<2x8xf32>
    %cst_119 = arith.constant dense<0.000000e+00> : vector<2x8xf32>
    %448 = tpu.matmul %444, %305, %cst_119 {dimension_numbers = #tpu.dot_dimension_numbers<[1], [0], [0], [1], [0, 0, 1, 1], [], []>} : vector<2x8xf32>, vector<8x8xf32>, vector<2x8xf32> -> vector<2x8xf32>
    %449 = math.log %448 : vector<2x8xf32>
    %450 = arith.addf %447, %449 : vector<2x8xf32>
    %451 = vector.extract_strided_slice %303 {offsets = [10, 0], sizes = [2, 8], strides = [1, 1]} : vector<16x8xf32> to vector<2x8xf32>
    %452 = arith.addf %450, %451 : vector<2x8xf32>
    %453 = vector.extract_strided_slice %7 {offsets = [10, 0], sizes = [2, 1], strides = [1, 1]} : vector<16x1xf32> to vector<2x1xf32>
    %cst_120 = arith.constant 0.000000e+00 : f32
    %454 = vector.broadcast %cst_120 : f32 to vector<2x1xf32>
    %455 = arith.cmpf ogt, %453, %454 : vector<2x1xf32>
    %456 = vector.shape_cast %455 : vector<2x1xi1> to vector<2x1xi1>
    %457 = vector.broadcast %456 : vector<2x1xi1> to vector<2x8xi1>
    %458 = arith.select %457, %452, %439 : vector<2x8xi1>, vector<2x8xf32>
    %cst_121 = arith.constant dense<0xFF800000> : vector<2xf32>
    %459 = vector.multi_reduction <maximumf>, %458, %cst_121 [1] : vector<2x8xf32> to vector<2xf32>
    %460 = vector.shape_cast %459 : vector<2xf32> to vector<2x1xf32>
    %461 = vector.broadcast %460 : vector<2x1xf32> to vector<2x8xf32>
    %462 = arith.subf %458, %461 : vector<2x8xf32>
    %463 = math.exp %462 : vector<2x8xf32>
    %464 = vector.broadcast %460 : vector<2x1xf32> to vector<2x8xf32>
    %465 = vector.broadcast %306 : vector<1x8xf32> to vector<2x8xf32>
    %466 = arith.addf %464, %465 : vector<2x8xf32>
    %cst_122 = arith.constant dense<0.000000e+00> : vector<2x8xf32>
    %467 = tpu.matmul %463, %305, %cst_122 {dimension_numbers = #tpu.dot_dimension_numbers<[1], [0], [0], [1], [0, 0, 1, 1], [], []>} : vector<2x8xf32>, vector<8x8xf32>, vector<2x8xf32> -> vector<2x8xf32>
    %468 = math.log %467 : vector<2x8xf32>
    %469 = arith.addf %466, %468 : vector<2x8xf32>
    %470 = vector.extract_strided_slice %303 {offsets = [12, 0], sizes = [2, 8], strides = [1, 1]} : vector<16x8xf32> to vector<2x8xf32>
    %471 = arith.addf %469, %470 : vector<2x8xf32>
    %472 = vector.extract_strided_slice %7 {offsets = [12, 0], sizes = [2, 1], strides = [1, 1]} : vector<16x1xf32> to vector<2x1xf32>
    %cst_123 = arith.constant 0.000000e+00 : f32
    %473 = vector.broadcast %cst_123 : f32 to vector<2x1xf32>
    %474 = arith.cmpf ogt, %472, %473 : vector<2x1xf32>
    %475 = vector.shape_cast %474 : vector<2x1xi1> to vector<2x1xi1>
    %476 = vector.broadcast %475 : vector<2x1xi1> to vector<2x8xi1>
    %477 = arith.select %476, %471, %458 : vector<2x8xi1>, vector<2x8xf32>
    %cst_124 = arith.constant dense<0xFF800000> : vector<2xf32>
    %478 = vector.multi_reduction <maximumf>, %477, %cst_124 [1] : vector<2x8xf32> to vector<2xf32>
    %479 = vector.shape_cast %478 : vector<2xf32> to vector<2x1xf32>
    %480 = vector.broadcast %479 : vector<2x1xf32> to vector<2x8xf32>
    %481 = arith.subf %477, %480 : vector<2x8xf32>
    %482 = math.exp %481 : vector<2x8xf32>
    %483 = vector.broadcast %479 : vector<2x1xf32> to vector<2x8xf32>
    %484 = vector.broadcast %306 : vector<1x8xf32> to vector<2x8xf32>
    %485 = arith.addf %483, %484 : vector<2x8xf32>
    %cst_125 = arith.constant dense<0.000000e+00> : vector<2x8xf32>
    %486 = tpu.matmul %482, %305, %cst_125 {dimension_numbers = #tpu.dot_dimension_numbers<[1], [0], [0], [1], [0, 0, 1, 1], [], []>} : vector<2x8xf32>, vector<8x8xf32>, vector<2x8xf32> -> vector<2x8xf32>
    %487 = math.log %486 : vector<2x8xf32>
    %488 = arith.addf %485, %487 : vector<2x8xf32>
    %489 = vector.extract_strided_slice %303 {offsets = [14, 0], sizes = [2, 8], strides = [1, 1]} : vector<16x8xf32> to vector<2x8xf32>
    %490 = arith.addf %488, %489 : vector<2x8xf32>
    %491 = vector.extract_strided_slice %7 {offsets = [14, 0], sizes = [2, 1], strides = [1, 1]} : vector<16x1xf32> to vector<2x1xf32>
    %cst_126 = arith.constant 0.000000e+00 : f32
    %492 = vector.broadcast %cst_126 : f32 to vector<2x1xf32>
    %493 = arith.cmpf ogt, %491, %492 : vector<2x1xf32>
    %494 = vector.shape_cast %493 : vector<2x1xi1> to vector<2x1xi1>
    %495 = vector.broadcast %494 : vector<2x1xi1> to vector<2x8xi1>
    %496 = arith.select %495, %490, %477 : vector<2x8xi1>, vector<2x8xf32>
    %497 = vector.broadcast %308 : vector<1x8xf32> to vector<2x8xf32>
    %498 = arith.addf %496, %497 : vector<2x8xf32>
    %cst_127 = arith.constant dense<0xFF800000> : vector<2xf32>
    %499 = vector.multi_reduction <maximumf>, %498, %cst_127 [1] : vector<2x8xf32> to vector<2xf32>
    %500 = vector.shape_cast %499 : vector<2xf32> to vector<2x1xf32>
    %501 = vector.broadcast %500 : vector<2x1xf32> to vector<2x8xf32>
    %502 = arith.subf %498, %501 : vector<2x8xf32>
    %503 = math.exp %502 : vector<2x8xf32>
    %cst_128 = arith.constant dense<0.000000e+00> : vector<2xf32>
    %504 = vector.multi_reduction <add>, %503, %cst_128 [1] : vector<2x8xf32> to vector<2xf32>
    %505 = vector.shape_cast %504 : vector<2xf32> to vector<2x1xf32>
    %506 = math.log %505 : vector<2x1xf32>
    %507 = arith.addf %500, %506 : vector<2x1xf32>
    %508 = vector.shape_cast %507 : vector<2x1xf32> to vector<1x2x1xf32>
    %cst_129 = arith.constant dense<0.000000e+00> : vector<1xf32>
    %509 = vector.multi_reduction <add>, %508, %cst_129 [1, 2] : vector<1x2x1xf32> to vector<1xf32>
    %510 = vector.shape_cast %509 : vector<1xf32> to vector<1x1x1xf32>
    %511 = vector.extract %510[0, 0, 0] : f32 from vector<1x1x1xf32>
    %512 = arith.subf %361, %511 : f32
    %cst_130 = arith.constant 0.000000e+00 : f32
    %513 = arith.subf %cst_130, %512 : f32
    %cst_131 = arith.constant 5.000000e-01 : f32
    %514 = arith.mulf %513, %cst_131 : f32
    %515 = vector.broadcast %514 : f32 to vector<1x1xf32>
    %c0_132 = arith.constant 0 : index
    %c0_133 = arith.constant 0 : index
    %516 = vector.load %arg9[%c0_132, %c0_133] : memref<1x1xf32, #tpu.memory_space<vmem>>, vector<1x1xf32>
    tpu.vector_store %arg9[%c0_132, %c0_133], %515 {strides = array<i32>} : memref<1x1xf32, #tpu.memory_space<vmem>>, vector<1x1xf32>,
    return
  }
}

</mosaic_0001>

<bundles_post_ra>
// kernel: ner_forward.1
= control target key start
LH: loop header
LB: loop body
LE: loop exit
PB: predicated region body
PF: predicated region fallthrough
CT: control target
= control target key end

     0   :  { %v2079_v3 = vmov 0   ;;  %s2731_s0 = inlined_call_operand.vmem [shape: s32[16,6], index: 0, kind: input, shape index: {}]   ;;  %s2732_s1 = inlined_call_operand.vmem [shape: f32[133,32], index: 1, kind: input, shape index: {}]   ;;  %s2733_s2 = inlined_call_operand.vmem [shape: f32[2,32,96], index: 2, kind: input, shape index: {}]   ;;  %s2734_s3 = inlined_call_operand.vmem [shape: f32[2,32,32], index: 3, kind: input, shape index: {}]   ;;  %s2735_s4 = inlined_call_operand.vmem [shape: f32[2,32,64], index: 4, kind: input, shape index: {}]   ;;  %s2736_s5 = inlined_call_operand.vmem [shape: f32[2,64,32], index: 5, kind: input, shape index: {}]   ;;  %s2737_s6 = inlined_call_operand.vmem [shape: f32[32,8], index: 6, kind: input, shape index: {}]   ;;  %s2738_s7 = inlined_call_operand.vmem [shape: f32[16,8], index: 7, kind: input, shape index: {}]   ;;  %s2739_s8 = inlined_call_operand.vmem [shape: f32[24,128], index: 8, kind: input, shape index: {}]   ;;  %s2740_s9 = inlined_call_operand.hbm [shape: f32[1,1], index: 9, kind: output, shape index: {}]  }
   0x1   :  { %v2149_v0 = vld [vmem:[%s2731_s0] sm:$0xff]  ;;  %v2154_v1 = vld [vmem:[%s2731_s0 + $0x8] sm:$0xff]  ;;  %v98_v2 = vld [vmem:[%s2732_s1 + $0x78] sm:$0xff]  ;;  %1925 = vset.pattern.permute.xlu0 %v2079_v3  ;;  %1927 = vset.pattern.permute.xlu1 %v2079_v3 }
   0x2   :  { %44 = vperm.xlu0 %1925, %v2149_v0   ;;  %47 = vperm.xlu1 %1927, %v2154_v1   ;;  %v97_v4 = vld [vmem:[%s2732_s1 + $0x70] sm:$0xff]  ;;  %v96_v5 = vld [vmem:[%s2732_s1 + $0x68] sm:$0xff] }
   0x3   :  { %111 = vmatpush.msra.mxu0 %v98_v2 }
   0x4   :  { %14 = vsyncpa [#allocation3], 0  ;;  %v95_v6 = vld [vmem:[%s2732_s1 + $0x60] sm:$0xff]  ;;  %v53_v7 = vadd.s32 100, %v2149_v0  ;;  %v54_v8 = vadd.s32 100, %v2154_v1  ;;  %v94_v9 = vld [vmem:[%s2732_s1 + $0x58] sm:$0xff]  ;;  %v40_v23 = vlaneseq }
   0x5   :  { %112 = vmatpush.msra.mxu0 %v97_v4  ;;  %v2080_v10 = vmov 5   ;;  %v93_v11 = vld [vmem:[%s2732_s1 + $0x50] sm:$0xff]  ;;  %v92_v12 = vld [vmem:[%s2732_s1 + $0x48] sm:$0xff]  ;;  %v91_v13 = vld [vmem:[%s2732_s1 + $0x40] sm:$0xff]  ;;  %vm107_vm0 = vcmask 1044480   ;;  %v2081_v30 = vmov 1.0   ;;  %v2246_v4 = vcvt.s32.f32 %v2154_v1 }
   0x6   :  { %v90_v14 = vld [vmem:[%s2732_s1 + $0x38] sm:$0xff]  ;;  %v89_v15 = vld [vmem:[%s2732_s1 + $0x30] sm:$0xff]  ;;  %v88_v16 = vld [vmem:[%s2732_s1 + $0x28] sm:$0xff]  ;;  %v2213_v26 = vand.u32 127, %v40_v23  ;;  %vm100_vm8 = vcmask 39936   ;;  %v2082_v31 = vmov 0.0  }
   0x7   :  { %113 = vmatpush.msra.mxu0 %v96_v5  ;;  %v87_v17 = vld [vmem:[%s2732_s1 + $0x20] sm:$0xff]  ;;  %v86_v18 = vld [vmem:[%s2732_s1 + $0x18] sm:$0xff]  ;;  %v85_v19 = vld [vmem:[%s2732_s1 + $0x10] sm:$0xff]  ;;  %v2083_v42 = vmov 32.0   ;;  %s2086_s14 = smov 112   ;;  %s2087_s15 = smov 80  }
   0x8   :  { %v84_v20 = vld [vmem:[%s2732_s1 + $0x8] sm:$0xff]  ;;  %v83_v21 = vld [vmem:[%s2732_s1] sm:$0xff]  ;;  %v42_v27 = vadd.s32 128, %v2213_v26  ;;  %1957 = vrcp.f32 %v2083_v42  ;;  %v282_v59 = vld [vmem:[%s2733_s2 + $0x18] sm:$0xff]  ;;  %s2088_s16 = smov 96   ;;  %s2089_s17 = smov 48  }
   0x9   :  { %114 = vmatpush.msra.mxu0 %v95_v6  ;;  %v99_v22 = vld [vmem:[%s2732_s1 + $0x80] sm:$0x1f]  ;;  %302 = vmatpush.msra.mxu3 %v282_v59  ;;  %v281_v60 = vld [vmem:[%s2733_s2 + $0x10] sm:$0xff]  ;;  %v280_v61 = vld [vmem:[%s2733_s2 + $0x8] sm:$0xff]  ;;  %v2084_v6 = vmov 4   ;;  %s2090_s18 = smov 64  }
   0xa   :  { %1926 = vset.pattern.permute.xlu0 %v2080_v10  ;;  %1928 = vset.pattern.permute.xlu1 %v2080_v10  ;;  %vm70_vm6 = vcmp.eq.s32.totalorder %v42_v27, 132  ;;  %v279_v62 = vld [vmem:[%s2733_s2] sm:$0xff]  ;;  %s2091_s19 = smov 16   ;;  %s2095_s29 = smov [#allocation2]  }
   0xb   :  { %56 = vperm.xlu0 %1926, %v53_v7   ;;  %59 = vperm.xlu1 %1928, %v54_v8   ;;  %v2085_v7 = vmov 2   ;;  %s1797_s30 = sshll.u32 %s2095_s29, 4  ;;  %s1799_s10 = sshll.u32 %s2740_s9, 4  ;;  %s1798_s30 = int_to_ptr.vmem [resolvable:$true] %s1797_s30  ;;  %s1800_s10 = int_to_ptr.hbm [resolvable:$true] %s1799_s10 }
   0xc   :  { %115 = vmatpush.msra.mxu0 %v94_v9  ;;  %1814 = vmatpush.msk.msra.mxu1 %vm107_vm0, %v99_v22 }
   0xd   :  { %303 = vmatpush.msra.mxu3 %v281_v60  ;;  %1930 = vset.pattern.permute.xlu2 %v2085_v7 }
   0xe   :  { %116 = vmatpush.msra.mxu0 %v93_v11  ;;  %v1958_v43 = vpop.eup %1957 }
   0xf   :  { %v165_v44 = vmul.f32 32.0, %v1958_v43  ;;  %304 = vmatpush.msra.mxu3 %v280_v61 }
  0x10   :  { %117 = vmatpush.msra.mxu0 %v92_v12 }
  0x11   :  { %v166_v45 = vsub.f32 1.0, %v165_v44  ;;  %305 = vmatpush.msra.mxu3 %v279_v62 }
  0x12   :  { %118 = vmatpush.msra.mxu0 %v91_v13 }
  0x13   :  { %v167_v46 = vmul.f32 %v1958_v43, %v166_v45  ;;  %1929 = vset.pattern.permute.xlu0 %v2084_v6 }
  0x14   :  { %119 = vmatpush.msra.mxu0 %v90_v14  ;;  %219 = vperm.xlu0 %1929, %v2154_v1  }
  0x15   :  { %v168_v47 = vadd.f32 %v1958_v43, %v167_v46 }
  0x16   :  { %120 = vmatpush.msra.mxu0 %v89_v15 }
  0x18   :  { %121 = vmatpush.msra.mxu0 %v88_v16  ;;  %v2255_v16 = vld [vmem:[%s2739_s8] sm:$0xff] }
  0x1a   :  { %122 = vmatpush.msra.mxu0 %v87_v17 }
  0x1c   :  { %123 = vmatpush.msra.mxu0 %v86_v18  ;;  %216 = vperm.xlu0 %1929, %v2149_v0  }
  0x1e   :  { %124 = vmatpush.msra.mxu0 %v85_v19  ;;  %v2258_v19 = vcvt.s32.f32 %v2149_v0 }
  0x20   :  { %125 = vmatpush.msra.mxu0 %v84_v20  ;;  %v209_v20 = vperm.slane %v2255_v16, 0 }
  0x22   :  { %126 = vmatpush.msra.mxu0 %v83_v21 }
  0x24   :  { %1931 = vset.pattern.permute.xlu0 %v2085_v7 }
  0x25   :  { %229 = vperm.xlu0 %1931, %v2258_v19  }
  0x74   :  { %v45_v24 = vpop.permute.xlu0 %44  ;;  %v48_v25 = vpop.permute.xlu1 %47 }
  0x75   :  { %vm50_vm1 = vcmp.eq.s32.totalorder %v42_v27, %v45_v24  ;;  %vm49_vm4 = vcmp.eq.s32.totalorder %v2213_v26, %v45_v24  ;;  %vm52_vm9 = vcmp.eq.s32.totalorder %v42_v27, %v48_v25  ;;  %vm51_vm12 = vcmp.eq.s32.totalorder %v2213_v26, %v48_v25 }
  0x76   :  { %v212_v24 = vperm.slane %v2255_v16, 1 }
  0x7d   :  { %v57_v28 = vpop.permute.xlu0 %56  ;;  %v60_v29 = vpop.permute.xlu1 %59 }
  0x7e   :  { %vm61_vm2 = vcmp.eq.s32.totalorder %v2213_v26, %v57_v28  ;;  %vm62_vm3 = vcmp.eq.s32.totalorder %v42_v27, %v57_v28  ;;  %vm64_vm10 = vcmp.eq.s32.totalorder %v42_v27, %v60_v29  ;;  %vm63_vm13 = vcmp.eq.s32.totalorder %v2213_v26, %v60_v29 }
  0x7f   :  { %vm66_vm5 = vmor %vm50_vm1, %vm62_vm3  ;;  %vm157_vm1 = vcmask 261120  }
  0x80   :  { %vm65_vm7 = vmor %vm49_vm4, %vm61_vm2  ;;  %vm169_vm2 = vweird.f32 %v1958_v43 }
  0x81   :  { %1812 = vmatmul.msk.f32.vlgmr.msra.gmra.mxu0 %vm65_vm7, %v2081_v30  ;;  %vm72_vm11 = vmor %vm66_vm5, %vm70_vm6  ;;  %v2226_v48 = vsel %vm169_vm2, %v1958_v43, %v168_v47 }
  0x82   :  { %v1809_v32 = vsel %vm72_vm11, 1.0, %v2082_v31  ;;  %vm68_vm14 = vmor %vm52_vm9, %vm64_vm10  ;;  %vm239_vm10 = vcmask 15360  }
  0x83   :  { %1815 = vmatmul.msk.f32.vlgmr.msra.gmra.mxu1 %vm100_vm8, %v1809_v32  ;;  %vm67_vm15 = vmor %vm51_vm12, %vm63_vm13  ;;  %vm319_vm12 = vcmask 130048  }
  0x84   :  { %vm74_vm0 = vmor %vm68_vm14, %vm70_vm6 }
  0x85   :  { %v1811_v33 = vsel %vm74_vm0, 1.0, %v2082_v31 }
  0x89   :  { %1813 = vmatmul.msk.f32.gmra.mxu0 %vm67_vm15, %v2081_v30 }
  0x8b   :  { %1816 = vmatmul.msk.f32.gmra.mxu1 %vm100_vm8, %v1811_v33 }
  0xfe   :  { %v128_v34 = vpop.f32.mrf.mxu0 }
 0x100   :  { %v151_v35 = vpop.f32.mrf.mxu1 }
 0x101   :  { %v152_v36 = vadd.f32 %v151_v35, %v128_v34  ;;  %v220_v35 = vpop.permute.xlu0 %219 }
 0x102   :  { %vm222_vm9 = vcmp.eq.s32.totalorder %v2213_v26, %v220_v35 }
 0x103   :  { %v158_v37 = vsel %vm157_vm1, %v152_v36, 0.0 }
 0x104   :  { %159 = vadd.xlane.f32.xlu2 %v158_v37  ;;  %v283_v37 = vperm.slane %v2255_v16, 2 }
 0x106   :  { %v131_v38 = vpop.f32.mrf.mxu0 }
 0x108   :  { %v154_v39 = vpop.f32.mrf.mxu1 }
 0x109   :  { %v155_v40 = vadd.f32 %v154_v39, %v131_v38  ;;  %v1818_v38 = vsel %vm222_vm9, 1.0, %v2082_v31  ;;  %v217_v42 = vpop.permute.xlu0 %216 }
 0x10a   :  { %vm221_vm11 = vcmp.eq.s32.totalorder %v2213_v26, %v217_v42 }
 0x10b   :  { %v161_v41 = vsel %vm157_vm1, %v155_v40, 0.0  ;;  %v1817_v45 = vsel %vm221_vm11, 1.0, %v2082_v31 }
 0x10c   :  { %162 = vadd.xlane.f32.xlu2 %v161_v41 }
 0x111   :  { %v230_v46 = vpop.permute.xlu0 %229 }
 0x112   :  { %v237_v47 = vmul.f32 %v1817_v45, %v230_v46 }
 0x177   :  { %v160_v49 = vpop.xlane.xlu2 %159 }
 0x178   :  { %v171_v50 = vmul.f32 %v2226_v48, %v160_v49 }
 0x17a   :  { %v173_v51 = vsub.f32 %v152_v36, %v171_v50 }
 0x17c   :  { %v175_v52 = vmul.f32 %v173_v51, %v173_v51 }
 0x17e   :  { %v177_v53 = vsel %vm157_vm1, %v175_v52, 0.0 }
 0x17f   :  { %178 = vadd.xlane.f32.xlu1 %v177_v53  ;;  %v163_v54 = vpop.xlane.xlu2 %162 }
 0x180   :  { %v172_v55 = vmul.f32 %v2226_v48, %v163_v54 }
 0x182   :  { %v174_v56 = vsub.f32 %v155_v40, %v172_v55 }
 0x184   :  { %v176_v57 = vmul.f32 %v174_v56, %v174_v56 }
 0x186   :  { %v180_v58 = vsel %vm157_vm1, %v176_v57, 0.0 }
 0x187   :  { %181 = vadd.xlane.f32.xlu2 %v180_v58 }
 0x19f   :  { %234 = vperm.xlu2 %1930, %v2246_v4  }
 0x1f2   :  { %v179_v63 = vpop.xlane.xlu1 %178 }
 0x1f3   :  { %v183_v2 = vmul.f32 %v179_v63, %v2226_v48 }
 0x1f5   :  { %v185_v5 = vadd.f32 1e-12, %v183_v2 }
 0x1f7   :  { %1959 = vrsqrt.f32 %v185_v5  ;;  %vm193_vm4 = vweird.f32 %v185_v5 }
 0x1fa   :  { %v182_v8 = vpop.xlane.xlu2 %181 }
 0x1fb   :  { %v184_v9 = vmul.f32 %v182_v8, %v2226_v48 }
 0x1fd   :  { %v1960_v10 = vpop.eup %1959  ;;  %v186_v11 = vadd.f32 1e-12, %v184_v9 }
 0x1fe   :  { %v188_v12 = vmul.f32 %v1960_v10, %v185_v5  ;;  %vm194_vm3 = vweird.f32 %v1960_v10 }
 0x1ff   :  { %1961 = vrsqrt.f32 %v186_v11  ;;  %vm195_vm5 = vmor %vm193_vm4, %vm194_vm3  ;;  %vm203_vm7 = vweird.f32 %v186_v11  ;;  %vm669_vm4 = vcmask 523264  }
 0x200   :  { %v189_v13 = vmul.f32 %v1960_v10, %v188_v12 }
 0x202   :  { %v190_v14 = vmul.f32 0.5, %v189_v13  ;;  %v235_v36 = vpop.permute.xlu2 %234 }
 0x203   :  { %v238_v39 = vmul.f32 %v1818_v38, %v235_v36 }
 0x204   :  { %v191_v15 = vsub.f32 1.5, %v190_v14 }
 0x205   :  { %v1962_v1 = vpop.eup %1961  ;;  %1819 = vmatpush.xpose.msk.msra.mxu2 %vm239_vm10, %v238_v39 }
 0x206   :  { %v192_v17 = vmul.f32 %v1960_v10, %v191_v15  ;;  %v198_v18 = vmul.f32 %v1962_v1, %v186_v11  ;;  %vm204_vm6 = vweird.f32 %v1962_v1 }
 0x207   :  { %vm205_vm8 = vmor %vm203_vm7, %vm204_vm6 }
 0x208   :  { %v196_v21 = vsel %vm195_vm5, %v1960_v10, %v192_v17  ;;  %v199_v22 = vmul.f32 %v1962_v1, %v198_v18 }
 0x209   :  { %v207_v23 = vmul.f32 %v196_v21, %v173_v51  ;;  %1820 = vmatpush.xpose.msk.msra.mxu2 %vm239_vm10, %v237_v47 }
 0x20a   :  { %v200_v25 = vmul.f32 0.5, %v199_v22 }
 0x20b   :  { %v210_v27 = vmul.f32 %v209_v20, %v207_v23 }
 0x20c   :  { %v201_v28 = vsub.f32 1.5, %v200_v25  ;;  %1821 = vmatmul.msk.f32.vlgmr.msra.gmra.mxu2 %vm239_vm10, %v1817_v45 }
 0x20d   :  { %v2263_v29 = vadd.f32 %v212_v24, %v210_v27 }
 0x20e   :  { %v202_v30 = vmul.f32 %v1962_v1, %v201_v28 }
 0x20f   :  { %1825 = vmatmul.msk.f32.vlgmr.msra.gmra.mxu3 %vm157_vm1, %v2263_v29 }
 0x210   :  { %v206_v0 = vsel %vm205_vm8, %v1962_v1, %v202_v30 }
 0x211   :  { %v208_v32 = vmul.f32 %v206_v0, %v174_v56 }
 0x213   :  { %v211_v33 = vmul.f32 %v209_v20, %v208_v32 }
 0x214   :  { %1822 = vmatmul.msk.f32.gmra.mxu2 %vm239_vm10, %v1818_v38 }
 0x215   :  { %v2267_v34 = vadd.f32 %v212_v24, %v211_v33 }
 0x217   :  { %1826 = vmatmul.msk.f32.gmra.mxu3 %vm157_vm1, %v2267_v34 }
 0x28f   :  { %v269_v55 = vpop.f32.mrf.mxu2 }
 0x290   :  { %v1823_v56 = vadd.f32 -1.0, %v269_v55 }
 0x292   :  { %v307_v40 = vpop.f32.mrf.mxu3  ;;  %v2294_v58 = vmul.f32 1e+09, %v1823_v56 }
 0x293   :  { %v308_v41 = vadd.f32 %v307_v40, %v283_v37 }
 0x295   :  { %412 = vrot.lane.b32.xlu1 %v308_v41, %s2086_s14 }
 0x297   :  { %v272_v60 = vpop.f32.mrf.mxu2 }
 0x298   :  { %v1824_v62 = vadd.f32 -1.0, %v272_v60 }
 0x29a   :  { %v310_v43 = vpop.f32.mrf.mxu3  ;;  %v2298_v5 = vmul.f32 1e+09, %v1824_v62 }
 0x29b   :  { %v311_v44 = vadd.f32 %v310_v43, %v283_v37 }
 0x29d   :  { %414 = vrot.lane.b32.xlu0 %v311_v44, %s2086_s14  ;;  %418 = vrot.lane.b32.xlu2 %v311_v44, %s2087_s15  ;;  %v1932_v17 = vpack.i.bf16 %v308_v41, %v311_v44 }
 0x2a5   :  { %315 = vrot.lane.b32.xlu0 %v308_v41, %s2088_s16  ;;  %416 = vrot.lane.b32.xlu2 %v308_v41, %s2087_s15 }
 0x2ad   :  { %317 = vrot.lane.b32.xlu2 %v311_v44, %s2088_s16 }
 0x2f7   :  { %v419_v49 = vpop.permute.xlu2 %418 }
 0x2f8   :  { %1833 = vmatpush.xpose.msk.msrb.mxu3 %vm319_vm12, %v419_v49 }
 0x2ff   :  { %v417_v50 = vpop.permute.xlu2 %416 }
 0x300   :  { %1834 = vmatpush.xpose.msk.msrb.mxu3 %vm319_vm12, %v417_v50 }
 0x307   :  { %v413_v51 = vpop.permute.xlu1 %412  ;;  %v318_v52 = vpop.permute.xlu2 %317 }
 0x308   :  { %1827 = vmatpush.xpose.msk.msrb.mxu1 %vm319_vm12, %v318_v52  ;;  %1835 = vmatmul.msk.f32.vlgmr.msrb.gmra.mxu3 %vm319_vm12, %v413_v51 }
 0x30f   :  { %v415_v53 = vpop.permute.xlu0 %414 }
 0x310   :  { %1836 = vmatmul.msk.f32.gmra.mxu3 %vm319_vm12, %v415_v53 }
 0x317   :  { %v316_v54 = vpop.permute.xlu0 %315 }
 0x318   :  { %1828 = vmatpush.xpose.msk.msrb.mxu1 %vm319_vm12, %v316_v54 }
 0x31b   :  { %1829 = vmatmul.msk.f32.vlgmr.msrb.gmra.mxu1 %vm319_vm12, %v308_v41 }
 0x323   :  { %1830 = vmatmul.msk.f32.gmra.mxu1 %vm319_vm12, %v311_v44 }
 0x38b   :  { %v445_v57 = vpop.f32.mrf.mxu3 }
 0x38c   :  { %v451_v59 = vmul.f32 0.25, %v445_v57 }
 0x38e   :  { %v453_v61 = vadd.f32 %v451_v59, %v2294_v58 }
 0x390   :  { %v455_v63 = vsel %vm319_vm12, %v453_v61, -inf }
 0x391   :  { %456 = vmax.xlane.f32.xlu2 %v455_v63 }
 0x393   :  { %v448_v2 = vpop.f32.mrf.mxu3 }
 0x394   :  { %v452_v6 = vmul.f32 0.25, %v448_v2  ;;  %v525_v2 = vld [vmem:[%s2734_s3 + $0x18] sm:$0xff] }
 0x396   :  { %v454_v7 = vadd.f32 %v452_v6, %v2298_v5  ;;  %v524_v6 = vld [vmem:[%s2734_s3 + $0x10] sm:$0xff] }
 0x398   :  { %v345_v8 = vpop.f32.mrf.mxu1  ;;  %v458_v9 = vsel %vm319_vm12, %v454_v7, -inf }
 0x399   :  { %v351_v10 = vmul.f32 0.25, %v345_v8  ;;  %459 = vmax.xlane.f32.xlu0 %v458_v9  ;;  %v522_v8 = vld [vmem:[%s2734_s3] sm:$0xff] }
 0x39b   :  { %v353_v11 = vadd.f32 %v351_v10, %v2294_v58 }
 0x39d   :  { %v355_v12 = vsel %vm319_vm12, %v353_v11, -inf }
 0x39e   :  { %356 = vmax.xlane.f32.xlu1 %v355_v12 }
 0x3a0   :  { %v348_v13 = vpop.f32.mrf.mxu1 }
 0x3a1   :  { %v352_v14 = vmul.f32 0.25, %v348_v13 }
 0x3a3   :  { %v354_v15 = vadd.f32 %v352_v14, %v2298_v5 }
 0x3a5   :  { %v358_v1 = vsel %vm319_vm12, %v354_v15, -inf }
 0x3a6   :  { %359 = vmax.xlane.f32.xlu2 %v358_v1 }
 0x3ad   :  { %1933 = vrot.lane.b32.xlu0 %v1932_v17, %s2089_s17 }
 0x404   :  { %v457_v18 = vpop.xlane.xlu2 %456 }
 0x405   :  { %v461_v20 = vsub.f32 %v453_v61, %v457_v18 }
 0x407   :  { %v463_v21 = vmul.f32 1.442695, %v461_v20 }
 0x409   :  { %1963 = vpow2.f32 %v463_v21 }
 0x40c   :  { %v460_v22 = vpop.xlane.xlu0 %459 }
 0x40d   :  { %v462_v23 = vsub.f32 %v454_v7, %v460_v22  ;;  %v523_v7 = vld [vmem:[%s2734_s3 + $0x8] sm:$0xff] }
 0x40f   :  { %v1964_v24 = vpop.eup %1963  ;;  %v465_v25 = vmul.f32 1.442695, %v462_v23 }
 0x410   :  { %v467_v27 = vsel %vm319_vm12, %v1964_v24, 0.0 }
 0x411   :  { %1965 = vpow2.f32 %v465_v25  ;;  %v357_v28 = vpop.xlane.xlu1 %356  ;;  %468 = vadd.xlane.f32.xlu2 %v467_v27 }
 0x412   :  { %v361_v30 = vsub.f32 %v353_v11, %v357_v28 }
 0x414   :  { %v363_v0 = vmul.f32 1.442695, %v361_v30 }
 0x416   :  { %1967 = vpow2.f32 %v363_v0 }
 0x417   :  { %v1966_v32 = vpop.eup %1965 }
 0x418   :  { %v470_v33 = vsel %vm319_vm12, %v1966_v32, 0.0 }
 0x419   :  { %471 = vadd.xlane.f32.xlu1 %v470_v33  ;;  %v360_v35 = vpop.xlane.xlu2 %359 }
 0x41a   :  { %v362_v36 = vsub.f32 %v354_v15, %v360_v35  ;;  %v526_v15 = vperm.slane %v2255_v16, 3 }
 0x41c   :  { %v1968_v37 = vpop.eup %1967  ;;  %v365_v38 = vmul.f32 1.442695, %v362_v36 }
 0x41d   :  { %v367_v39 = vsel %vm319_vm12, %v1968_v37, 0.0 }
 0x41e   :  { %1969 = vpow2.f32 %v365_v38  ;;  %368 = vadd.xlane.f32.xlu2 %v367_v39  ;;  %v609_v38 = vld [vmem:[%s2735_s4 + $0x8] sm:$0xff]  ;;  %v608_v39 = vld [vmem:[%s2735_s4] sm:$0xff] }
 0x41f   :  { %v1934_v40 = vpop.permute.xlu0 %1933 }
 0x420   :  { %v1935_v41 = vunpack.i.l.bf16 %v1934_v40  ;;  %v1936_v42 = vunpack.i.h.bf16 %v1934_v40 }
 0x422   :  { %503 = vmatpush.msra.mxu1 %v1935_v41 }
 0x424   :  { %v1970_v43 = vpop.eup %1969  ;;  %504 = vmatpush.msra.mxu1 %v1936_v42 }
 0x425   :  { %v370_v44 = vsel %vm319_vm12, %v1970_v43, 0.0 }
 0x426   :  { %371 = vadd.xlane.f32.xlu2 %v370_v44 }
 0x432   :  { %1938 = vrot.lane.b32.xlu1 %v1932_v17, %s2090_s18 }
 0x484   :  { %v469_v45 = vpop.xlane.xlu2 %468 }
 0x485   :  { %1971 = vrcp.f32 %v469_v45 }
 0x48b   :  { %v1972_v46 = vpop.eup %1971 }
 0x48c   :  { %v475_v47 = vmul.f32 %v1972_v46, %v1964_v24  ;;  %v472_v49 = vpop.xlane.xlu1 %471 }
 0x48d   :  { %1973 = vrcp.f32 %v472_v49 }
 0x48e   :  { %1837 = vmatmul.msk.f32.vlgmr.msra.gmra.mxu1 %vm319_vm12, %v475_v47 }
 0x491   :  { %v369_v52 = vpop.xlane.xlu2 %368 }
 0x492   :  { %1975 = vrcp.f32 %v369_v52 }
 0x493   :  { %v1974_v50 = vpop.eup %1973 }
 0x494   :  { %v476_v51 = vmul.f32 %v1974_v50, %v1966_v32 }
 0x496   :  { %1838 = vmatmul.msk.f32.gmra.mxu1 %vm319_vm12, %v476_v51 }
 0x498   :  { %v1976_v55 = vpop.eup %1975 }
 0x499   :  { %v372_v53 = vpop.xlane.xlu2 %371  ;;  %v375_v59 = vmul.f32 %v1976_v55, %v1968_v37  ;;  %v610_v37 = vld [vmem:[%s2735_s4 + $0x10] sm:$0xff]  ;;  %v602_v55 = vperm.slane %v2255_v16, 4 }
 0x49a   :  { %1977 = vrcp.f32 %v372_v53 }
 0x4a0   :  { %v1978_v60 = vpop.eup %1977 }
 0x4a1   :  { %v376_v61 = vmul.f32 %v1978_v60, %v1970_v43  ;;  %v605_v60 = vperm.slane %v2255_v16, 5 }
 0x4a4   :  { %v1939_v54 = vpop.permute.xlu1 %1938 }
 0x4a5   :  { %v1940_v56 = vunpack.i.l.bf16 %v1939_v54  ;;  %v1941_v57 = vunpack.i.h.bf16 %v1939_v54 }
 0x4a7   :  { %403 = vmatpush.msrb.mxu2 %v1940_v56 }
 0x4a9   :  { %404 = vmatpush.msrb.mxu2 %v1941_v57 }
 0x4aa   :  { %1831 = vmatmul.msk.f32.vlgmr.msrb.gmra.mxu2 %vm319_vm12, %v375_v59 }
 0x4ab   :  { %545 = vmatpush.msra.mxu2 %v525_v2 }
 0x4ad   :  { %546 = vmatpush.msra.mxu2 %v524_v6 }
 0x4af   :  { %547 = vmatpush.msra.mxu2 %v523_v7 }
 0x4b1   :  { %548 = vmatpush.msra.mxu2 %v522_v8 }
 0x4b2   :  { %1832 = vmatmul.msk.f32.gmra.mxu2 %vm319_vm12, %v376_v61 }
 0x50b   :  { %v506_v62 = vpop.f32.mrf.mxu1 }
 0x50c   :  { %514 = vrot.lane.b32.xlu0 %v506_v62, %s2091_s19 }
 0x513   :  { %v509_v63 = vpop.f32.mrf.mxu1 }
 0x514   :  { %516 = vrot.lane.b32.xlu2 %v509_v63, %s2091_s19 }
 0x52d   :  { %v406_v9 = vpop.f32.mrf.mxu2 }
 0x535   :  { %v409_v13 = vpop.f32.mrf.mxu2 }
 0x56e   :  { %v517_v12 = vpop.permute.xlu2 %516 }
 0x56f   :  { %v521_v14 = vsel %vm319_vm12, %v409_v13, %v517_v12  ;;  %v666_v12 = vld [vmem:[%s2736_s5 + $0x30] sm:$0xff]  ;;  %v665_v13 = vld [vmem:[%s2736_s5 + $0x28] sm:$0xff] }
 0x57e   :  { %v515_v10 = vpop.permute.xlu0 %514 }
 0x57f   :  { %v520_v11 = vsel %vm319_vm12, %v406_v9, %v515_v10 }
 0x580   :  { %1839 = vmatmul.msk.f32.vlgmr.msra.gmra.mxu2 %vm157_vm1, %v520_v11  ;;  %v667_v11 = vld [vmem:[%s2736_s5 + $0x38] sm:$0xff] }
 0x581   :  { %684 = vmatpush.msrb.mxu0 %v667_v11 }
 0x583   :  { %685 = vmatpush.msrb.mxu0 %v666_v12 }
 0x585   :  { %686 = vmatpush.msrb.mxu0 %v665_v13 }
 0x588   :  { %1840 = vmatmul.msk.f32.gmra.mxu2 %vm157_vm1, %v521_v14  ;;  %v664_v14 = vld [vmem:[%s2736_s5 + $0x20] sm:$0xff] }
 0x589   :  { %687 = vmatpush.msrb.mxu0 %v664_v14 }
 0x603   :  { %v550_v1 = vpop.f32.mrf.mxu2 }
 0x604   :  { %v551_v17 = vadd.f32 %v550_v1, %v526_v15  ;;  %v662_v1 = vld [vmem:[%s2736_s5 + $0x10] sm:$0xff] }
 0x606   :  { %v556_v18 = vadd.f32 %v551_v17, %v2263_v29  ;;  %v661_v17 = vld [vmem:[%s2736_s5 + $0x8] sm:$0xff] }
 0x608   :  { %v558_v20 = vsel %vm157_vm1, %v556_v18, 0.0 }
 0x609   :  { %559 = vadd.xlane.f32.xlu0 %v558_v20  ;;  %v612_v20 = vperm.slane %v2255_v16, 6 }
 0x60b   :  { %v553_v21 = vpop.f32.mrf.mxu2 }
 0x60c   :  { %v554_v22 = vadd.f32 %v553_v21, %v526_v15  ;;  %v663_v15 = vld [vmem:[%s2736_s5 + $0x18] sm:$0xff] }
 0x60d   :  { %688 = vmatpush.msrb.mxu0 %v663_v15 }
 0x60e   :  { %v557_v23 = vadd.f32 %v554_v22, %v2267_v34  ;;  %v611_v34 = vld [vmem:[%s2735_s4 + $0x18] sm:$0xff] }
 0x60f   :  { %631 = vmatpush.msra.mxu3 %v611_v34  ;;  %689 = vmatpush.msrb.mxu0 %v662_v1 }
 0x610   :  { %v561_v24 = vsel %vm157_vm1, %v557_v23, 0.0 }
 0x611   :  { %562 = vadd.xlane.f32.xlu1 %v561_v24  ;;  %632 = vmatpush.msra.mxu3 %v610_v37 }
 0x612   :  { %690 = vmatpush.msrb.mxu0 %v661_v17 }
 0x613   :  { %633 = vmatpush.msra.mxu3 %v609_v38 }
 0x615   :  { %634 = vmatpush.msra.mxu3 %v608_v39 }
 0x67c   :  { %v560_v25 = vpop.xlane.xlu0 %559 }
 0x67d   :  { %v564_v27 = vmul.f32 %v560_v25, %v2226_v48 }
 0x67f   :  { %v566_v28 = vsub.f32 %v556_v18, %v564_v27  ;;  %v660_v18 = vld [vmem:[%s2736_s5] sm:$0xff] }
 0x680   :  { %691 = vmatpush.msrb.mxu0 %v660_v18 }
 0x681   :  { %v568_v30 = vmul.f32 %v566_v28, %v566_v28 }
 0x683   :  { %v570_v0 = vsel %vm157_vm1, %v568_v30, 0.0 }
 0x684   :  { %571 = vadd.xlane.f32.xlu2 %v570_v0  ;;  %v563_v32 = vpop.xlane.xlu1 %562 }
 0x685   :  { %v565_v29 = vmul.f32 %v563_v32, %v2226_v48 }
 0x687   :  { %v567_v33 = vsub.f32 %v557_v23, %v565_v29 }
 0x689   :  { %v569_v35 = vmul.f32 %v567_v33, %v567_v33 }
 0x68b   :  { %v573_v36 = vsel %vm157_vm1, %v569_v35, 0.0 }
 0x68c   :  { %574 = vadd.xlane.f32.xlu0 %v573_v36 }
 0x6f7   :  { %v572_v40 = vpop.xlane.xlu2 %571 }
 0x6f8   :  { %v576_v41 = vmul.f32 %v572_v40, %v2226_v48 }
 0x6fa   :  { %v578_v42 = vadd.f32 1e-12, %v576_v41 }
 0x6fc   :  { %1979 = vrsqrt.f32 %v578_v42  ;;  %vm586_vm14 = vweird.f32 %v578_v42 }
 0x6ff   :  { %v575_v43 = vpop.xlane.xlu0 %574 }
 0x700   :  { %v577_v44 = vmul.f32 %v575_v43, %v2226_v48 }
 0x702   :  { %v1980_v45 = vpop.eup %1979  ;;  %v579_v46 = vadd.f32 1e-12, %v577_v44  ;;  %v668_v44 = vperm.slane %v2255_v16, 7 }
 0x703   :  { %v581_v47 = vmul.f32 %v1980_v45, %v578_v42  ;;  %vm587_vm13 = vweird.f32 %v1980_v45 }
 0x704   :  { %1981 = vrsqrt.f32 %v579_v46  ;;  %vm588_vm15 = vmor %vm586_vm14, %vm587_vm13  ;;  %vm596_vm2 = vweird.f32 %v579_v46 }
 0x705   :  { %v582_v49 = vmul.f32 %v1980_v45, %v581_v47 }
 0x707   :  { %v583_v50 = vmul.f32 0.5, %v582_v49 }
 0x709   :  { %v584_v51 = vsub.f32 1.5, %v583_v50 }
 0x70a   :  { %v1982_v52 = vpop.eup %1981 }
 0x70b   :  { %v585_v53 = vmul.f32 %v1980_v45, %v584_v51  ;;  %v591_v54 = vmul.f32 %v1982_v52, %v579_v46  ;;  %vm597_vm0 = vweird.f32 %v1982_v52 }
 0x70c   :  { %vm598_vm3 = vmor %vm596_vm2, %vm597_vm0 }
 0x70d   :  { %v589_v56 = vsel %vm588_vm15, %v1980_v45, %v585_v53  ;;  %v592_v57 = vmul.f32 %v1982_v52, %v591_v54 }
 0x70e   :  { %v600_v59 = vmul.f32 %v589_v56, %v566_v28 }
 0x70f   :  { %v593_v61 = vmul.f32 0.5, %v592_v57 }
 0x710   :  { %v603_v62 = vmul.f32 %v602_v55, %v600_v59 }
 0x711   :  { %v594_v63 = vsub.f32 1.5, %v593_v61 }
 0x712   :  { %v606_v2 = vadd.f32 %v605_v60, %v603_v62 }
 0x713   :  { %v595_v6 = vmul.f32 %v1982_v52, %v594_v63 }
 0x714   :  { %1841 = vmatmul.msk.f32.vlgmr.msra.gmra.mxu3 %vm157_vm1, %v606_v2 }
 0x715   :  { %v599_v7 = vsel %vm598_vm3, %v1982_v52, %v595_v6  ;;  %v1847_v6 = vld [vmem:[%s2733_s2 + $0x30] sm:$0xff] }
 0x716   :  { %v601_v8 = vmul.f32 %v599_v7, %v567_v33  ;;  %v1846_v7 = vld [vmem:[%s2733_s2 + $0x28] sm:$0xff] }
 0x718   :  { %v604_v9 = vmul.f32 %v602_v55, %v601_v8  ;;  %v1845_v8 = vld [vmem:[%s2733_s2 + $0x20] sm:$0xff] }
 0x71a   :  { %v607_v10 = vadd.f32 %v605_v60, %v604_v9 }
 0x71c   :  { %1842 = vmatmul.msk.f32.gmra.mxu3 %vm157_vm1, %v607_v10 }
 0x797   :  { %v636_v21 = vpop.f32.mrf.mxu3 }
 0x798   :  { %v637_v22 = vadd.f32 %v636_v21, %v612_v20 }
 0x79a   :  { %v644_v23 = vmul.f32 0.044715, %v637_v22  ;;  %v642_v37 = vmul.f32 0.5, %v637_v22 }
 0x79c   :  { %v646_v24 = vmul.f32 %v644_v23, %v637_v22 }
 0x79e   :  { %v648_v25 = vmul.f32 %v646_v24, %v637_v22 }
 0x79f   :  { %v639_v27 = vpop.f32.mrf.mxu3 }
 0x7a0   :  { %v640_v28 = vadd.f32 %v639_v27, %v612_v20  ;;  %v650_v30 = vadd.f32 %v648_v25, %v637_v22  ;;  %v2412_v20 = vld [vmem:[%s2739_s8 + $0x8] sm:$0xff] }
 0x7a1   :  { %v745_v25 = vperm.slane %v2412_v20, 0 }
 0x7a2   :  { %v645_v0 = vmul.f32 0.044715, %v640_v28  ;;  %v652_v32 = vmul.f32 0.7978846, %v650_v30  ;;  %v643_v41 = vmul.f32 0.5, %v640_v28 }
 0x7a4   :  { %1983 = vtanh.f32 %v652_v32  ;;  %v647_v29 = vmul.f32 %v645_v0, %v640_v28  ;;  %v748_v0 = vperm.slane %v2412_v20, 1 }
 0x7a6   :  { %v649_v33 = vmul.f32 %v647_v29, %v640_v28 }
 0x7a8   :  { %v651_v35 = vadd.f32 %v649_v33, %v640_v28 }
 0x7aa   :  { %v1984_v36 = vpop.eup %1983  ;;  %v653_v34 = vmul.f32 0.7978846, %v651_v35 }
 0x7ab   :  { %v656_v38 = vadd.f32 1.0, %v1984_v36 }
 0x7ac   :  { %1985 = vtanh.f32 %v653_v34 }
 0x7ad   :  { %v658_v39 = vmul.f32 %v656_v38, %v642_v37 }
 0x7af   :  { %1843 = vmatmul.msk.f32.vlgmr.msrb.gmra.mxu0 %vm669_vm4, %v658_v39 }
 0x7b2   :  { %v1986_v40 = vpop.eup %1985 }
 0x7b3   :  { %v657_v42 = vadd.f32 1.0, %v1986_v40  ;;  %v756_v40 = vperm.slane %v2412_v20, 2 }
 0x7b5   :  { %v659_v43 = vmul.f32 %v657_v42, %v643_v41 }
 0x7b7   :  { %1844 = vmatmul.msk.f32.gmra.mxu0 %vm669_vm4, %v659_v43 }
 0x82c   :  { %v693_v45 = vpop.f32.mrf.mxu0 }
 0x82d   :  { %v694_v46 = vadd.f32 %v693_v45, %v668_v44 }
 0x82f   :  { %v699_v47 = vadd.f32 %v694_v46, %v606_v2  ;;  %v1848_v2 = vld [vmem:[%s2733_s2 + $0x38] sm:$0xff] }
 0x830   :  { %775 = vmatpush.msrb.mxu1 %v1848_v2 }
 0x831   :  { %v701_v49 = vsel %vm157_vm1, %v699_v47, 0.0 }
 0x832   :  { %702 = vadd.xlane.f32.xlu0 %v701_v49  ;;  %776 = vmatpush.msrb.mxu1 %v1847_v6 }
 0x834   :  { %v696_v50 = vpop.f32.mrf.mxu0  ;;  %777 = vmatpush.msrb.mxu1 %v1846_v7 }
 0x835   :  { %v697_v51 = vadd.f32 %v696_v50, %v668_v44 }
 0x836   :  { %778 = vmatpush.msrb.mxu1 %v1845_v8 }
 0x837   :  { %v700_v52 = vadd.f32 %v697_v51, %v607_v10 }
 0x839   :  { %v704_v53 = vsel %vm157_vm1, %v700_v52, 0.0 }
 0x83a   :  { %705 = vadd.xlane.f32.xlu1 %v704_v53 }
 0x8a5   :  { %v703_v54 = vpop.xlane.xlu0 %702 }
 0x8a6   :  { %v707_v55 = vmul.f32 %v703_v54, %v2226_v48 }
 0x8a8   :  { %v709_v56 = vsub.f32 %v699_v47, %v707_v55 }
 0x8aa   :  { %v711_v57 = vmul.f32 %v709_v56, %v709_v56 }
 0x8ac   :  { %v713_v59 = vsel %vm157_vm1, %v711_v57, 0.0 }
 0x8ad   :  { %v706_v16 = vpop.xlane.xlu1 %705  ;;  %714 = vadd.xlane.f32.xlu0 %v713_v59 }
 0x8ae   :  { %v708_v60 = vmul.f32 %v706_v16, %v2226_v48 }
 0x8b0   :  { %v710_v61 = vsub.f32 %v700_v52, %v708_v60 }
 0x8b2   :  { %v712_v62 = vmul.f32 %v710_v61, %v710_v61 }
 0x8b4   :  { %v716_v63 = vsel %vm157_vm1, %v712_v62, 0.0 }
 0x8b5   :  { %717 = vadd.xlane.f32.xlu1 %v716_v63 }
 0x920   :  { %v715_v9 = vpop.xlane.xlu0 %714 }
 0x921   :  { %v719_v10 = vmul.f32 %v715_v9, %v2226_v48 }
 0x923   :  { %v721_v11 = vadd.f32 1e-12, %v719_v10 }
 0x925   :  { %1987 = vrsqrt.f32 %v721_v11  ;;  %vm729_vm6 = vweird.f32 %v721_v11 }
 0x928   :  { %v718_v12 = vpop.xlane.xlu1 %717 }
 0x929   :  { %v720_v13 = vmul.f32 %v718_v12, %v2226_v48 }
 0x92b   :  { %v1988_v14 = vpop.eup %1987  ;;  %v722_v15 = vadd.f32 1e-12, %v720_v13 }
 0x92c   :  { %v724_v1 = vmul.f32 %v1988_v14, %v721_v11  ;;  %vm730_vm5 = vweird.f32 %v1988_v14 }
 0x92d   :  { %1989 = vrsqrt.f32 %v722_v15  ;;  %vm731_vm7 = vmor %vm729_vm6, %vm730_vm5  ;;  %vm739_vm9 = vweird.f32 %v722_v15  ;;  %vm1276_vm6 = vcmask 58368  }
 0x92e   :  { %v725_v17 = vmul.f32 %v1988_v14, %v724_v1 }
 0x930   :  { %v726_v18 = vmul.f32 0.5, %v725_v17 }
 0x932   :  { %v727_v21 = vsub.f32 1.5, %v726_v18 }
 0x933   :  { %v1990_v22 = vpop.eup %1989 }
 0x934   :  { %v728_v23 = vmul.f32 %v1988_v14, %v727_v21  ;;  %v734_v24 = vmul.f32 %v1990_v22, %v722_v15  ;;  %vm740_vm8 = vweird.f32 %v1990_v22 }
 0x935   :  { %vm741_vm10 = vmor %vm739_vm9, %vm740_vm8  ;;  %vm1295_vm8 = vcmask 64512   ;;  %vm1485_vm9 = vcmask 60418  }
 0x936   :  { %v732_v27 = vsel %vm731_vm7, %v1988_v14, %v728_v23  ;;  %v735_v28 = vmul.f32 %v1990_v22, %v734_v24  ;;  %vm1472_vm7 = vcmp.gt.f32.partialorder %v2258_v19, 0.0 }
 0x937   :  { %v743_v30 = vmul.f32 %v732_v27, %v709_v56  ;;  %v1866_v27 = vld [vmem:[%s2734_s3 + $0x38] sm:$0xff] }
 0x938   :  { %v736_v32 = vmul.f32 0.5, %v735_v28  ;;  %v1865_v28 = vld [vmem:[%s2734_s3 + $0x30] sm:$0xff] }
 0x939   :  { %v746_v29 = vmul.f32 %v745_v25, %v743_v30  ;;  %v1864_v30 = vld [vmem:[%s2734_s3 + $0x28] sm:$0xff] }
 0x93a   :  { %v737_v33 = vsub.f32 1.5, %v736_v32 }
 0x93b   :  { %v2416_v35 = vadd.f32 %v748_v0, %v746_v29 }
 0x93c   :  { %v738_v36 = vmul.f32 %v1990_v22, %v737_v33 }
 0x93d   :  { %1849 = vmatmul.msk.f32.vlgmr.msrb.gmra.mxu1 %vm157_vm1, %v2416_v35 }
 0x93e   :  { %v742_v34 = vsel %vm741_vm10, %v1990_v22, %v738_v36  ;;  %v1863_v36 = vld [vmem:[%s2734_s3 + $0x20] sm:$0xff]  ;;  %vm1531_vm10 = vcmask 62468  }
 0x93f   :  { %v744_v37 = vmul.f32 %v742_v34, %v710_v61 }
 0x941   :  { %v747_v38 = vmul.f32 %v745_v25, %v744_v37 }
 0x943   :  { %v2420_v39 = vadd.f32 %v748_v0, %v747_v38 }
 0x945   :  { %1850 = vmatmul.msk.f32.gmra.mxu1 %vm157_vm1, %v2420_v39 }
 0x9ba   :  { %v780_v41 = vpop.f32.mrf.mxu1 }
 0x9bb   :  { %v781_v42 = vadd.f32 %v780_v41, %v756_v40 }
 0x9bd   :  { %884 = vrot.lane.b32.xlu1 %v781_v42, %s2086_s14  ;;  %888 = vrot.lane.b32.xlu0 %v781_v42, %s2087_s15 }
 0x9c2   :  { %v783_v43 = vpop.f32.mrf.mxu1 }
 0x9c3   :  { %v784_v44 = vadd.f32 %v783_v43, %v756_v40 }
 0x9c5   :  { %890 = vrot.lane.b32.xlu2 %v784_v44, %s2087_s15  ;;  %788 = vrot.lane.b32.xlu0 %v781_v42, %s2088_s16  ;;  %v1942_v16 = vpack.i.bf16 %v781_v42, %v784_v44 }
 0x9cd   :  { %790 = vrot.lane.b32.xlu2 %v784_v44, %s2088_s16 }
 0xa1f   :  { %v891_v45 = vpop.permute.xlu2 %890 }
 0xa20   :  { %1857 = vmatpush.xpose.msk.msra.mxu0 %vm319_vm12, %v891_v45 }
 0xa27   :  { %v791_v46 = vpop.permute.xlu2 %790 }
 0xa28   :  { %1851 = vmatpush.xpose.msk.msrb.mxu2 %vm319_vm12, %v791_v46 }
 0xa2f   :  { %v889_v47 = vpop.permute.xlu0 %888  ;;  %v885_v49 = vpop.permute.xlu1 %884 }
 0xa30   :  { %1858 = vmatpush.xpose.msk.msra.mxu0 %vm319_vm12, %v889_v47 }
 0xa33   :  { %1859 = vmatmul.msk.f32.vlgmr.msra.gmra.mxu0 %vm319_vm12, %v885_v49 }
 0xa37   :  { %v789_v50 = vpop.permute.xlu0 %788 }
 0xa38   :  { %1852 = vmatpush.xpose.msk.msrb.mxu2 %vm319_vm12, %v789_v50 }
 0xa3b   :  { %1853 = vmatmul.msk.f32.vlgmr.msrb.gmra.mxu2 %vm319_vm12, %v781_v42  ;;  %v999_v42 = vperm.slane %v2412_v20, 3 }
 0xa3c   :  { %1018 = vmatpush.msra.mxu2 %v1866_v27 }
 0xa3e   :  { %1019 = vmatpush.msra.mxu2 %v1865_v28 }
 0xa40   :  { %1020 = vmatpush.msra.mxu2 %v1864_v30 }
 0xa42   :  { %1021 = vmatpush.msra.mxu2 %v1863_v36  ;;  %v1879_v36 = vld [vmem:[%s2736_s5 + $0x60] sm:$0xff] }
 0xa43   :  { %1854 = vmatmul.msk.f32.gmra.mxu2 %vm319_vm12, %v784_v44 }
 0xab0   :  { %v917_v51 = vpop.f32.mrf.mxu0 }
 0xab1   :  { %v923_v52 = vmul.f32 0.25, %v917_v51 }
 0xab3   :  { %v925_v53 = vadd.f32 %v923_v52, %v2294_v58 }
 0xab5   :  { %v927_v54 = vsel %vm319_vm12, %v925_v53, -inf }
 0xab6   :  { %928 = vmax.xlane.f32.xlu1 %v927_v54 }
 0xabe   :  { %v817_v55 = vpop.f32.mrf.mxu2 }
 0xabf   :  { %v823_v56 = vmul.f32 0.25, %v817_v55 }
 0xac1   :  { %v825_v57 = vadd.f32 %v823_v56, %v2294_v58 }
 0xac3   :  { %v827_v59 = vsel %vm319_vm12, %v825_v57, -inf }
 0xac4   :  { %828 = vmax.xlane.f32.xlu2 %v827_v59 }
 0xac6   :  { %v820_v0 = vpop.f32.mrf.mxu2 }
 0xac7   :  { %v824_v32 = vmul.f32 0.25, %v820_v0 }
 0xac9   :  { %v826_v29 = vadd.f32 %v824_v32, %v2298_v5  ;;  %v1882_v32 = vld [vmem:[%s2736_s5 + $0x78] sm:$0xff] }
 0xaca   :  { %1158 = vmatpush.msrb.mxu0 %v1882_v32 }
 0xacb   :  { %v830_v33 = vsel %vm319_vm12, %v826_v29, -inf }
 0xacf   :  { %1943 = vrot.lane.b32.xlu1 %v1942_v16, %s2089_s17 }
 0xad7   :  { %886 = vrot.lane.b32.xlu1 %v784_v44, %s2086_s14 }
 0xb29   :  { %v929_v60 = vpop.xlane.xlu1 %928 }
 0xb2a   :  { %v933_v61 = vsub.f32 %v925_v53, %v929_v60 }
 0xb2c   :  { %v935_v62 = vmul.f32 1.442695, %v933_v61 }
 0xb2e   :  { %1991 = vpow2.f32 %v935_v62 }
 0xb34   :  { %v1992_v63 = vpop.eup %1991 }
 0xb35   :  { %v939_v2 = vsel %vm319_vm12, %v1992_v63, 0.0 }
 0xb36   :  { %940 = vadd.xlane.f32.xlu0 %v939_v2 }
 0xb37   :  { %v829_v6 = vpop.xlane.xlu2 %828 }
 0xb38   :  { %v833_v7 = vsub.f32 %v825_v57, %v829_v6 }
 0xb3a   :  { %v835_v8 = vmul.f32 1.442695, %v833_v7  ;;  %v1872_v7 = vld [vmem:[%s2735_s4 + $0x38] sm:$0xff] }
 0xb3c   :  { %1993 = vpow2.f32 %v835_v8  ;;  %v1871_v8 = vld [vmem:[%s2735_s4 + $0x30] sm:$0xff] }
 0xb41   :  { %v1944_v58 = vpop.permute.xlu1 %1943 }
 0xb42   :  { %v1994_v9 = vpop.eup %1993  ;;  %v1945_v10 = vunpack.i.l.bf16 %v1944_v58  ;;  %v1946_v12 = vunpack.i.h.bf16 %v1944_v58  ;;  %v1870_v58 = vld [vmem:[%s2735_s4 + $0x28] sm:$0xff] }
 0xb43   :  { %v839_v11 = vsel %vm319_vm12, %v1994_v9, 0.0 }
 0xb44   :  { %975 = vmatpush.msra.mxu1 %v1945_v10  ;;  %840 = vadd.xlane.f32.xlu2 %v839_v11 }
 0xb46   :  { %976 = vmatpush.msra.mxu1 %v1946_v12 }
 0xb49   :  { %v887_v13 = vpop.permute.xlu1 %886 }
 0xb4a   :  { %1948 = vrot.lane.b32.xlu0 %v1942_v16, %s2090_s18  ;;  %1860 = vmatmul.msk.f32.gmra.mxu0 %vm319_vm12, %v887_v13 }
 0xba9   :  { %v941_v14 = vpop.xlane.xlu0 %940 }
 0xbaa   :  { %1995 = vrcp.f32 %v941_v14 }
 0xbb0   :  { %v1996_v15 = vpop.eup %1995 }
 0xbb1   :  { %v947_v1 = vmul.f32 %v1996_v15, %v1992_v63 }
 0xbb3   :  { %1861 = vmatmul.msk.f32.vlgmr.msra.gmra.mxu1 %vm319_vm12, %v947_v1 }
 0xbb7   :  { %v841_v17 = vpop.xlane.xlu2 %840 }
 0xbb8   :  { %1997 = vrcp.f32 %v841_v17 }
 0xbbc   :  { %v1949_v18 = vpop.permute.xlu0 %1948 }
 0xbbd   :  { %v1950_v21 = vunpack.i.l.bf16 %v1949_v18  ;;  %v1951_v24 = vunpack.i.h.bf16 %v1949_v18 }
 0xbbe   :  { %v1998_v22 = vpop.eup %1997 }
 0xbbf   :  { %v847_v23 = vmul.f32 %v1998_v22, %v1994_v9  ;;  %875 = vmatpush.msrb.mxu3 %v1950_v21  ;;  %v1869_v9 = vld [vmem:[%s2735_s4 + $0x20] sm:$0xff]  ;;  %v1075_v21 = vperm.slane %v2412_v20, 4 }
 0xbc1   :  { %876 = vmatpush.msrb.mxu3 %v1951_v24 }
 0xbc2   :  { %1855 = vmatmul.msk.f32.vlgmr.msrb.gmra.mxu3 %vm319_vm12, %v847_v23 }
 0xbc3   :  { %1105 = vmatpush.msra.mxu3 %v1872_v7 }
 0xbc5   :  { %1106 = vmatpush.msra.mxu3 %v1871_v8 }
 0xbc7   :  { %v920_v50 = vpop.f32.mrf.mxu0  ;;  %1107 = vmatpush.msra.mxu3 %v1870_v58 }
 0xbc8   :  { %v924_v51 = vmul.f32 0.25, %v920_v50 }
 0xbc9   :  { %1108 = vmatpush.msra.mxu3 %v1869_v9 }
 0xbca   :  { %v926_v53 = vadd.f32 %v924_v51, %v2298_v5 }
 0xbcc   :  { %v930_v54 = vsel %vm319_vm12, %v926_v53, -inf }
 0xc30   :  { %v978_v25 = vpop.f32.mrf.mxu1 }
 0xc31   :  { %986 = vrot.lane.b32.xlu2 %v978_v25, %s2091_s19  ;;  %v1078_v25 = vperm.slane %v2412_v20, 5 }
 0xc45   :  { %v878_v34 = vpop.f32.mrf.mxu3 }
 0xc5a   :  { %831 = vmax.xlane.f32.xlu2 %v830_v33  ;;  %v1880_v33 = vld [vmem:[%s2736_s5 + $0x68] sm:$0xff] }
 0xc8b   :  { %v987_v37 = vpop.permute.xlu2 %986 }
 0xc8c   :  { %v992_v38 = vsel %vm319_vm12, %v878_v34, %v987_v37  ;;  %v1878_v34 = vld [vmem:[%s2736_s5 + $0x58] sm:$0xff]  ;;  %v1877_v37 = vld [vmem:[%s2736_s5 + $0x50] sm:$0xff] }
 0xc8d   :  { %1867 = vmatmul.msk.f32.vlgmr.msra.gmra.mxu2 %vm157_vm1, %v992_v38  ;;  %v1876_v38 = vld [vmem:[%s2736_s5 + $0x48] sm:$0xff] }
 0xccd   :  { %v832_v40 = vpop.xlane.xlu2 %831 }
 0xcce   :  { %v834_v41 = vsub.f32 %v826_v29, %v832_v40  ;;  %v1881_v29 = vld [vmem:[%s2736_s5 + $0x70] sm:$0xff]  ;;  %v1875_v40 = vld [vmem:[%s2736_s5 + $0x40] sm:$0xff] }
 0xccf   :  { %1159 = vmatpush.msrb.mxu0 %v1881_v29 }
 0xcd0   :  { %v837_v43 = vmul.f32 1.442695, %v834_v41 }
 0xcd1   :  { %1160 = vmatpush.msrb.mxu0 %v1880_v33 }
 0xcd2   :  { %1999 = vpow2.f32 %v837_v43 }
 0xcd3   :  { %1161 = vmatpush.msrb.mxu0 %v1879_v36 }
 0xcd5   :  { %1162 = vmatpush.msrb.mxu0 %v1878_v34 }
 0xcd7   :  { %1163 = vmatpush.msrb.mxu0 %v1877_v37 }
 0xcd8   :  { %v2000_v49 = vpop.eup %1999 }
 0xcd9   :  { %v842_v52 = vsel %vm319_vm12, %v2000_v49, 0.0  ;;  %1164 = vmatpush.msrb.mxu0 %v1876_v38 }
 0xcdb   :  { %1165 = vmatpush.msrb.mxu0 %v1875_v40 }
 0xd10   :  { %v1023_v44 = vpop.f32.mrf.mxu2 }
 0xd11   :  { %v1024_v45 = vadd.f32 %v1023_v44, %v999_v42  ;;  %v1086_v44 = vperm.slane %v2412_v20, 6 }
 0xd13   :  { %v1029_v46 = vadd.f32 %v1024_v45, %v2416_v35 }
 0xd15   :  { %v1031_v47 = vsel %vm157_vm1, %v1029_v46, 0.0 }
 0xd16   :  { %1032 = vadd.xlane.f32.xlu0 %v1031_v47 }
 0xd1e   :  { %843 = vadd.xlane.f32.xlu0 %v842_v52 }
 0xd26   :  { %931 = vmax.xlane.f32.xlu0 %v930_v54 }
 0xd89   :  { %v1033_v55 = vpop.xlane.xlu0 %1032 }
 0xd8a   :  { %v1037_v56 = vmul.f32 %v1033_v55, %v2226_v48 }
 0xd8c   :  { %v1039_v57 = vsub.f32 %v1029_v46, %v1037_v56 }
 0xd8e   :  { %v1041_v35 = vmul.f32 %v1039_v57, %v1039_v57 }
 0xd90   :  { %v1043_v59 = vsel %vm157_vm1, %v1041_v35, 0.0 }
 0xd91   :  { %1044 = vadd.xlane.f32.xlu1 %v1043_v59  ;;  %v844_v16 = vpop.xlane.xlu0 %843  ;;  %v1143_v59 = vperm.slane %v2412_v20, 7 }
 0xd92   :  { %2001 = vrcp.f32 %v844_v16 }
 0xd98   :  { %v2002_v60 = vpop.eup %2001 }
 0xd99   :  { %v932_v61 = vpop.xlane.xlu0 %931  ;;  %v848_v62 = vmul.f32 %v2002_v60, %v2000_v49 }
 0xd9a   :  { %v934_v63 = vsub.f32 %v926_v53, %v932_v61 }
 0xd9b   :  { %1856 = vmatmul.msk.f32.gmra.mxu3 %vm319_vm12, %v848_v62 }
 0xd9c   :  { %v937_v5 = vmul.f32 1.442695, %v934_v63 }
 0xd9e   :  { %2003 = vpow2.f32 %v937_v5 }
 0xda4   :  { %v2004_v2 = vpop.eup %2003 }
 0xda5   :  { %v942_v6 = vsel %vm319_vm12, %v2004_v2, 0.0 }
 0xda6   :  { %943 = vadd.xlane.f32.xlu2 %v942_v6 }
 0xe04   :  { %v1045_v10 = vpop.xlane.xlu1 %1044 }
 0xe05   :  { %v1049_v11 = vmul.f32 %v1045_v10, %v2226_v48 }
 0xe07   :  { %v1051_v12 = vadd.f32 1e-12, %v1049_v11 }
 0xe09   :  { %2005 = vrsqrt.f32 %v1051_v12  ;;  %vm1059_vm13 = vweird.f32 %v1051_v12 }
 0xe0f   :  { %v2006_v13 = vpop.eup %2005 }
 0xe10   :  { %v1054_v14 = vmul.f32 %v2006_v13, %v1051_v12  ;;  %vm1060_vm11 = vweird.f32 %v2006_v13 }
 0xe11   :  { %vm1061_vm14 = vmor %vm1059_vm13, %vm1060_vm11 }
 0xe12   :  { %v1055_v15 = vmul.f32 %v2006_v13, %v1054_v14 }
 0xe14   :  { %v1056_v1 = vmul.f32 0.5, %v1055_v15  ;;  %v1227_v15 = vld [vmem:[%s2737_s6 + $0x10] sm:$0xff] }
 0xe16   :  { %v1057_v17 = vsub.f32 1.5, %v1056_v1  ;;  %v1226_v1 = vld [vmem:[%s2737_s6 + $0x8] sm:$0xff] }
 0xe18   :  { %v1058_v18 = vmul.f32 %v2006_v13, %v1057_v17  ;;  %v1225_v17 = vld [vmem:[%s2737_s6] sm:$0xff] }
 0xe19   :  { %v944_v22 = vpop.xlane.xlu2 %943 }
 0xe1a   :  { %v1062_v23 = vsel %vm1061_vm14, %v2006_v13, %v1058_v18  ;;  %2007 = vrcp.f32 %v944_v22 }
 0xe1b   :  { %v1073_v24 = vmul.f32 %v1062_v23, %v1039_v57 }
 0xe1d   :  { %v1076_v27 = vmul.f32 %v1075_v21, %v1073_v24 }
 0xe1e   :  { %v881_v41 = vpop.f32.mrf.mxu3 }
 0xe1f   :  { %v1079_v28 = vadd.f32 %v1078_v25, %v1076_v27 }
 0xe20   :  { %v2008_v30 = vpop.eup %2007 }
 0xe21   :  { %1873 = vmatmul.msk.f32.vlgmr.msra.gmra.mxu3 %vm157_vm1, %v1079_v28  ;;  %v948_v0 = vmul.f32 %v2008_v30, %v2004_v2 }
 0xe23   :  { %1862 = vmatmul.msk.f32.gmra.mxu1 %vm319_vm12, %v948_v0  ;;  %v2558_v0 = vld [vmem:[%s2739_s8 + $0x10] sm:$0xff] }
 0xe24   :  { %v1219_v33 = vperm.slane %v2558_v0, 0  ;;  %v1222_v37 = vperm.slane %v2558_v0, 1 }
 0xea0   :  { %v981_v43 = vpop.f32.mrf.mxu1 }
 0xea1   :  { %988 = vrot.lane.b32.xlu1 %v981_v43, %s2091_s19 }
 0xea4   :  { %v1110_v45 = vpop.f32.mrf.mxu3 }
 0xea5   :  { %v1111_v46 = vadd.f32 %v1110_v45, %v1086_v44 }
 0xea7   :  { %v1118_v47 = vmul.f32 0.044715, %v1111_v46  ;;  %v1116_v54 = vmul.f32 0.5, %v1111_v46 }
 0xea9   :  { %v1120_v49 = vmul.f32 %v1118_v47, %v1111_v46 }
 0xeab   :  { %v1122_v50 = vmul.f32 %v1120_v49, %v1111_v46 }
 0xead   :  { %v1124_v51 = vadd.f32 %v1122_v50, %v1111_v46 }
 0xeaf   :  { %v1126_v52 = vmul.f32 0.7978846, %v1124_v51 }
 0xeb1   :  { %2009 = vtanh.f32 %v1126_v52 }
 0xeb7   :  { %v2010_v53 = vpop.eup %2009 }
 0xeb8   :  { %v1130_v55 = vadd.f32 1.0, %v2010_v53 }
 0xeba   :  { %v1132_v56 = vmul.f32 %v1130_v55, %v1116_v54 }
 0xebc   :  { %1883 = vmatmul.msk.f32.vlgmr.msrb.gmra.mxu0 %vm669_vm4, %v1132_v56 }
 0xf13   :  { %v989_v57 = vpop.permute.xlu1 %988 }
 0xf14   :  { %v993_v35 = vsel %vm319_vm12, %v881_v41, %v989_v57  ;;  %v1229_v57 = vperm.slane %v2558_v0, 2 }
 0xf15   :  { %1868 = vmatmul.msk.f32.gmra.mxu2 %vm157_vm1, %v993_v35  ;;  %v1273_v35 = vperm.slane %v2558_v0, 3 }
 0xf39   :  { %v1167_v16 = vpop.f32.mrf.mxu0 }
 0xf3a   :  { %v1168_v60 = vadd.f32 %v1167_v16, %v1143_v59 }
 0xf3c   :  { %v1173_v61 = vadd.f32 %v1168_v60, %v1079_v28 }
 0xf3e   :  { %v1175_v62 = vsel %vm157_vm1, %v1173_v61, 0.0 }
 0xf3f   :  { %1176 = vadd.xlane.f32.xlu0 %v1175_v62 }
 0xf98   :  { %v1026_v63 = vpop.f32.mrf.mxu2 }
 0xf99   :  { %v1027_v5 = vadd.f32 %v1026_v63, %v999_v42 }
 0xf9b   :  { %v1030_v2 = vadd.f32 %v1027_v5, %v2420_v39  ;;  %v1228_v39 = vld [vmem:[%s2737_s6 + $0x18] sm:$0xff]  ;;  %v2092_v5 = vmov 3  }
 0xf9c   :  { %1248 = vmatpush.msrb.mxu1 %v1228_v39  ;;  %1952 = vset.pattern.permute.xlu2 %v2092_v5 }
 0xf9d   :  { %v1034_v6 = vsel %vm157_vm1, %v1030_v2, 0.0  ;;  %1953 = vset.pattern.permute.xlu0 %v2092_v5 }
 0xf9e   :  { %1035 = vadd.xlane.f32.xlu0 %v1034_v6  ;;  %1249 = vmatpush.msrb.mxu1 %v1227_v15 }
 0xfa0   :  { %1250 = vmatpush.msrb.mxu1 %v1226_v1  ;;  %v2605_v1 = vperm.slane %v2558_v0, 5 }
 0xfa2   :  { %1251 = vmatpush.msrb.mxu1 %v1225_v17 }
 0xfb2   :  { %v1177_v7 = vpop.xlane.xlu0 %1176 }
 0xfb3   :  { %v1181_v8 = vmul.f32 %v1177_v7, %v2226_v48 }
 0xfb5   :  { %v1183_v58 = vsub.f32 %v1173_v61, %v1181_v8 }
 0xfb7   :  { %v1185_v9 = vmul.f32 %v1183_v58, %v1183_v58 }
 0xfb9   :  { %v1187_v10 = vsel %vm157_vm1, %v1185_v9, 0.0 }
 0xfba   :  { %1188 = vadd.xlane.f32.xlu2 %v1187_v10 }
0x1011   :  { %v1036_v11 = vpop.xlane.xlu0 %1035 }
0x1012   :  { %v1038_v12 = vmul.f32 %v1036_v11, %v2226_v48 }
0x1014   :  { %v1040_v13 = vsub.f32 %v1030_v2, %v1038_v12  ;;  %v1473_v2 = vsel %vm1472_vm7, 1, %v2079_v3  ;;  %vm1341_vm7 = vcmask 1041408  }
0x1016   :  { %v1042_v14 = vmul.f32 %v1040_v13, %v1040_v13 }
0x1018   :  { %v1046_v42 = vsel %vm157_vm1, %v1042_v14, 0.0 }
0x1019   :  { %1047 = vadd.xlane.f32.xlu2 %v1046_v42 }
0x102d   :  { %v1189_v18 = vpop.xlane.xlu2 %1188 }
0x102e   :  { %v1193_v22 = vmul.f32 %v1189_v18, %v2226_v48 }
0x1030   :  { %v1195_v23 = vadd.f32 1e-12, %v1193_v22 }
0x1031   :  { %1475 = vperm.xlu2 %1952, %v1473_v2  }
0x1032   :  { %2011 = vrsqrt.f32 %v1195_v23  ;;  %vm1203_vm15 = vweird.f32 %v1195_v23 }
0x1038   :  { %v2012_v24 = vpop.eup %2011 }
0x1039   :  { %v1198_v27 = vmul.f32 %v2012_v24, %v1195_v23  ;;  %vm1204_vm12 = vweird.f32 %v2012_v24 }
0x103a   :  { %vm1205_vm0 = vmor %vm1203_vm15, %vm1204_vm12  ;;  %vm1577_vm12 = vcmask 64518   ;;  %vm1616_vm15 = vcmp.gt.f32.partialorder %v2246_v4, 0.0 }
0x103b   :  { %v1199_v28 = vmul.f32 %v2012_v24, %v1198_v27 }
0x103d   :  { %v1200_v30 = vmul.f32 0.5, %v1199_v28 }
0x103f   :  { %v1201_v32 = vsub.f32 1.5, %v1200_v30 }
0x1041   :  { %v1202_v29 = vmul.f32 %v2012_v24, %v1201_v32 }
0x1043   :  { %v1206_v36 = vsel %vm1205_vm0, %v2012_v24, %v1202_v29 }
0x1044   :  { %v1217_v34 = vmul.f32 %v1206_v36, %v1183_v58 }
0x1046   :  { %v1220_v38 = vmul.f32 %v1219_v33, %v1217_v34 }
0x1048   :  { %v1223_v40 = vadd.f32 %v1222_v37, %v1220_v38 }
0x104a   :  { %1885 = vmatmul.msk.f32.vlgmr.msrb.gmra.mxu1 %vm157_vm1, %v1223_v40 }
0x108c   :  { %v1048_v41 = vpop.xlane.xlu2 %1047 }
0x108d   :  { %v1050_v43 = vmul.f32 %v1048_v41, %v2226_v48 }
0x108f   :  { %v1052_v45 = vadd.f32 1e-12, %v1050_v43 }
0x1091   :  { %2013 = vrsqrt.f32 %v1052_v45  ;;  %vm1069_vm3 = vweird.f32 %v1052_v45 }
0x1094   :  { %v2610_v27 = vpop.permute.xlu2 %1475 }
0x1097   :  { %v2014_v46 = vpop.eup %2013 }
0x1098   :  { %v1064_v47 = vmul.f32 %v2014_v46, %v1052_v45  ;;  %vm1070_vm2 = vweird.f32 %v2014_v46 }
0x1099   :  { %vm1071_vm5 = vmor %vm1069_vm3, %vm1070_vm2  ;;  %vm1289_vm3 = vcmask 1045504  }
0x109a   :  { %v1065_v49 = vmul.f32 %v2014_v46, %v1064_v47 }
0x109c   :  { %v1066_v50 = vmul.f32 0.5, %v1065_v49 }
0x109e   :  { %v1067_v51 = vsub.f32 1.5, %v1066_v50 }
0x10a0   :  { %v1068_v52 = vmul.f32 %v2014_v46, %v1067_v51 }
0x10a2   :  { %v1072_v53 = vsel %vm1071_vm5, %v2014_v46, %v1068_v52  ;;  %vm1335_vm5 = vcmask 62464  }
0x10a3   :  { %v1074_v54 = vmul.f32 %v1072_v53, %v1040_v13 }
0x10a5   :  { %v1077_v55 = vmul.f32 %v1075_v21, %v1074_v54 }
0x10a7   :  { %v2572_v56 = vadd.f32 %v1078_v25, %v1077_v55  ;;  %v2587_v25 = vld [vmem:[%s2738_s7 + $0x8] sm:$0xff] }
0x10a8   :  { %1462 = vmatpush.msrb.mxu3 %v2587_v25  ;;  %1512 = vmatpush.msra.mxu0 %v2587_v25 }
0x10a9   :  { %1874 = vmatmul.msk.f32.gmra.mxu3 %vm157_vm1, %v2572_v56  ;;  %1604 = vmatpush.msra.mxu1 %v2587_v25 }
0x10aa   :  { %1558 = vmatpush.msra.mxu3 %v2587_v25  ;;  %1654 = vmatpush.msrb.mxu0 %v2587_v25 }
0x10c7   :  { %v1253_v16 = vpop.f32.mrf.mxu1 }
0x10c8   :  { %v1254_v60 = vadd.f32 %v1253_v16, %v1229_v57 }
0x10ca   :  { %v2580_v61 = vadd.f32 %v1273_v35, %v1254_v60  ;;  %v2608_v23 = vrot.slane %v1254_v60, 2 }
0x10cc   :  { %v1436_v21 = vsel %vm1276_vm6, %v2580_v61, -inf  ;;  %v1482_v32 = vrot.slane %v2580_v61, 6 }
0x10cd   :  { %1437 = vmax.xlane.f32.xlu0 %v1436_v21 }
0x112c   :  { %v1113_v62 = vpop.f32.mrf.mxu3 }
0x112d   :  { %v1114_v63 = vadd.f32 %v1113_v62, %v1086_v44 }
0x112f   :  { %v1119_v6 = vmul.f32 0.044715, %v1114_v63  ;;  %v1117_v12 = vmul.f32 0.5, %v1114_v63 }
0x1131   :  { %v1121_v7 = vmul.f32 %v1119_v6, %v1114_v63 }
0x1133   :  { %v1123_v8 = vmul.f32 %v1121_v7, %v1114_v63 }
0x1135   :  { %v1125_v58 = vadd.f32 %v1123_v8, %v1114_v63 }
0x1137   :  { %v1127_v9 = vmul.f32 0.7978846, %v1125_v58 }
0x1139   :  { %2015 = vtanh.f32 %v1127_v9 }
0x113f   :  { %v2016_v10 = vpop.eup %2015 }
0x1140   :  { %v1438_v11 = vpop.xlane.xlu0 %1437  ;;  %v1131_v13 = vadd.f32 1.0, %v2016_v10 }
0x1141   :  { %v1439_v44 = vsub.f32 %v2580_v61, %v1438_v11  ;;  %v1443_v18 = vadd.f32 %v2605_v1, %v1438_v11 }
0x1142   :  { %v1133_v14 = vmul.f32 %v1131_v13, %v1117_v12 }
0x1143   :  { %v1440_v42 = vmul.f32 1.442695, %v1439_v44 }
0x1144   :  { %1884 = vmatmul.msk.f32.gmra.mxu0 %vm669_vm4, %v1133_v14  ;;  %vm1477_vm4 = vcmp.eq.s32.totalorder %v2610_v27, 1  ;;  %v2051_v27 = vld [vmem:[%s2731_s0 + $0x8] sm:$0xff] }
0x1145   :  { %2017 = vpow2.f32 %v1440_v42 }
0x114b   :  { %v2018_v39 = vpop.eup %2017 }
0x114c   :  { %1891 = vmatmul.msk.f32.vlgmr.msrb.gmra.mxu3 %vm1295_vm8, %v2018_v39 }
0x114d   :  { %1741 = vmatpush.msrb.mxu3 %v2587_v25 }
0x11c1   :  { %v1170_v45 = vpop.f32.mrf.mxu0 }
0x11c2   :  { %v1171_v16 = vadd.f32 %v1170_v45, %v1143_v59 }
0x11c4   :  { %v1174_v21 = vadd.f32 %v1171_v16, %v2572_v56 }
0x11c6   :  { %v1178_v62 = vsel %vm157_vm1, %v1174_v21, 0.0 }
0x11cf   :  { %v1464_v15 = vpop.f32.mrf.mxu3 }
0x11d0   :  { %2019 = vlog2.f32 %v1464_v15 }
0x11d6   :  { %v2020_v17 = vpop.eup %2019 }
0x11d7   :  { %v1468_v22 = vmul.f32 0.6931472, %v2020_v17 }
0x11d9   :  { %v1469_v24 = vadd.f32 %v1468_v22, %v1443_v18 }
0x11db   :  { %v1471_v28 = vadd.f32 %v1469_v24, %v2608_v23 }
0x11dd   :  { %v1479_v30 = vrot.slane %v1471_v28, 6 }
0x11df   :  { %v1484_v29 = vsel %vm1477_vm4, %v1479_v30, %v1482_v32 }
0x11e0   :  { %v1486_v36 = vsel %vm1485_vm9, %v1484_v29, -inf  ;;  %v1528_v54 = vrot.slane %v1484_v29, 6 }
0x11e1   :  { %1487 = vmax.xlane.f32.xlu1 %v1486_v36 }
0x1254   :  { %v1488_v34 = vpop.xlane.xlu1 %1487 }
0x1255   :  { %v1489_v38 = vsub.f32 %v1484_v29, %v1488_v34  ;;  %v1492_v50 = vadd.f32 %v1488_v34, %v2605_v1 }
0x1257   :  { %v1490_v40 = vmul.f32 1.442695, %v1489_v38 }
0x1259   :  { %2021 = vpow2.f32 %v1490_v40 }
0x125f   :  { %v2022_v41 = vpop.eup %2021 }
0x1260   :  { %v1494_v43 = vrot.slane %v2022_v41, 2 }
0x1262   :  { %1892 = vmatmul.msk.f32.vlgmr.msra.gmra.mxu0 %vm1295_vm8, %v1494_v43 }
0x12df   :  { %v1514_v46 = vpop.f32.mrf.mxu0 }
0x12e0   :  { %2023 = vlog2.f32 %v1514_v46 }
0x12e6   :  { %v2024_v47 = vpop.eup %2023 }
0x12e7   :  { %v1518_v49 = vmul.f32 0.6931472, %v2024_v47 }
0x12e9   :  { %v1520_v51 = vrot.slane %v1518_v49, 6 }
0x12eb   :  { %v1522_v52 = vadd.f32 %v1520_v51, %v1492_v50  ;;  %v2093_v50 = vmov 1  }
0x12ec   :  { %1954 = vset.pattern.permute.xlu1 %v2093_v50 }
0x12ed   :  { %v1523_v53 = vadd.f32 %v1522_v52, %v2608_v23 }
0x12ef   :  { %v1525_v55 = vrot.slane %v1523_v53, 6 }
0x12f1   :  { %v1530_v35 = vsel %vm1477_vm4, %v1525_v55, %v1528_v54 }
0x12f2   :  { %v1532_v60 = vsel %vm1531_vm10, %v1530_v35, -inf  ;;  %v1574_v38 = vrot.slane %v1530_v35, 6 }
0x12f3   :  { %1533 = vmax.xlane.f32.xlu0 %v1532_v60 }
0x12fb   :  { %1179 = vadd.xlane.f32.xlu0 %v1178_v62 }
0x1366   :  { %v1534_v63 = vpop.xlane.xlu0 %1533 }
0x1367   :  { %v1535_v2 = vsub.f32 %v1530_v35, %v1534_v63  ;;  %v1538_v30 = vadd.f32 %v1534_v63, %v2605_v1 }
0x1369   :  { %v1536_v6 = vmul.f32 1.442695, %v1535_v2 }
0x136b   :  { %2025 = vpow2.f32 %v1536_v6  ;;  %v2052_v6 = vld [vmem:[%s2731_s0] sm:$0xff]  ;;  %s2094_s0 = smov 125  }
0x136e   :  { %v1180_v7 = vpop.xlane.xlu0 %1179 }
0x136f   :  { %v1182_v8 = vmul.f32 %v1180_v7, %v2226_v48  ;;  %v1259_v7 = vld [vmem:[%s2738_s7] sm:$0xff] }
0x1370   :  { %1317 = vmatpush.msrb.mxu2 %v1259_v7 }
0x1371   :  { %v2026_v58 = vpop.eup %2025  ;;  %v1184_v9 = vsub.f32 %v1174_v21, %v1182_v8 }
0x1372   :  { %v1540_v10 = vrot.slane %v2026_v58, 4  ;;  %1696 = vmatpush.msra.mxu2 %v2587_v25 }
0x1373   :  { %v1186_v20 = vmul.f32 %v1184_v9, %v1184_v9 }
0x1374   :  { %1893 = vmatmul.msk.f32.vlgmr.msra.gmra.mxu3 %vm1295_vm8, %v1540_v10 }
0x1375   :  { %v1190_v59 = vsel %vm157_vm1, %v1186_v20, 0.0 }
0x1376   :  { %1191 = vadd.xlane.f32.xlu0 %v1190_v59 }
0x13e9   :  { %v1192_v56 = vpop.xlane.xlu0 %1191 }
0x13ea   :  { %v1194_v11 = vmul.f32 %v1192_v56, %v2226_v48 }
0x13ec   :  { %v1196_v12 = vadd.f32 1e-12, %v1194_v11 }
0x13ee   :  { %2027 = vrsqrt.f32 %v1196_v12  ;;  %vm1213_vm13 = vweird.f32 %v1196_v12 }
0x13f4   :  { %v2028_v13 = vpop.eup %2027 }
0x13f5   :  { %v1208_v44 = vmul.f32 %v2028_v13, %v1196_v12  ;;  %vm1214_vm11 = vweird.f32 %v2028_v13 }
0x13f6   :  { %vm1215_vm14 = vmor %vm1213_vm13, %vm1214_vm11 }
0x13f7   :  { %v1209_v14 = vmul.f32 %v2028_v13, %v1208_v44  ;;  %v1560_v42 = vpop.f32.mrf.mxu3 }
0x13f8   :  { %2029 = vlog2.f32 %v1560_v42 }
0x13f9   :  { %v1210_v39 = vmul.f32 0.5, %v1209_v14 }
0x13fb   :  { %v1211_v15 = vsub.f32 1.5, %v1210_v39 }
0x13fd   :  { %v1212_v17 = vmul.f32 %v2028_v13, %v1211_v15 }
0x13fe   :  { %v2030_v18 = vpop.eup %2029 }
0x13ff   :  { %v1216_v22 = vsel %vm1215_vm14, %v2028_v13, %v1212_v17  ;;  %v1564_v24 = vmul.f32 0.6931472, %v2030_v18 }
0x1400   :  { %v1218_v28 = vmul.f32 %v1216_v22, %v1184_v9 }
0x1401   :  { %v1566_v48 = vrot.slane %v1564_v24, 4 }
0x1402   :  { %v1221_v32 = vmul.f32 %v1219_v33, %v1218_v28  ;;  %v1617_v33 = vsel %vm1616_vm15, 1, %v2079_v3 }
0x1403   :  { %v1568_v29 = vadd.f32 %v1566_v48, %v1538_v30  ;;  %1619 = vperm.xlu0 %1953, %v1617_v33  }
0x1404   :  { %v1224_v36 = vadd.f32 %v1222_v37, %v1221_v32 }
0x1405   :  { %v1569_v34 = vadd.f32 %v1568_v29, %v2608_v23 }
0x1406   :  { %1886 = vmatmul.msk.f32.gmra.mxu1 %vm157_vm1, %v1224_v36 }
0x1407   :  { %v1571_v40 = vrot.slane %v1569_v34, 6 }
0x1409   :  { %v1576_v41 = vsel %vm1477_vm4, %v1571_v40, %v1574_v38  ;;  %vm1362_vm4 = vcmask 5120  }
0x140a   :  { %v1578_v43 = vsel %vm1577_vm12, %v1576_v41, -inf }
0x140b   :  { %1579 = vmax.xlane.f32.xlu2 %v1578_v43  ;;  %1955 = vset.pattern.permute.xlu0 %v2093_v50 }
0x140c   :  { %1265 = vperm.xlu0 %1955, %v2051_v27  }
0x1414   :  { %1956 = vset.pattern.permute.xlu0 %v2092_v5  ;;  %v1626_v5 = vrot.slane %v1576_v41, 6 }
0x1475   :  { %v2654_v21 = vpop.permute.xlu0 %1619 }
0x1476   :  { %vm1621_vm1 = vcmp.eq.s32.totalorder %v2654_v21, 1 }
0x147e   :  { %v1580_v45 = vpop.xlane.xlu2 %1579  ;;  %v1266_v56 = vpop.permute.xlu0 %1265 }
0x147f   :  { %v1581_v37 = vsub.f32 %v1576_v41, %v1580_v45  ;;  %v1584_v55 = vadd.f32 %v1580_v45, %v2605_v1  ;;  %vm1268_vm2 = vcmp.eq.s32.totalorder %v2213_v26, %v1266_v56 }
0x1480   :  { %v1888_v25 = vsel %vm1268_vm2, 1.0, %v2082_v31 }
0x1481   :  { %v1582_v46 = vmul.f32 1.442695, %v1581_v37  ;;  %v1326_v18 = vrot.slane %v1888_v25, 2 }
0x1483   :  { %2031 = vpow2.f32 %v1582_v46  ;;  %v1256_v51 = vpop.f32.mrf.mxu1 }
0x1484   :  { %v1257_v53 = vadd.f32 %v1256_v51, %v1229_v57 }
0x1486   :  { %v2652_v16 = vrot.slane %v1257_v53, 2 }
0x1488   :  { %v1292_v22 = vsel %vm1289_vm3, %v2608_v23, %v2652_v16 }
0x1489   :  { %v2032_v47 = vpop.eup %2031 }
0x148a   :  { %v1586_v49 = vrot.slane %v2032_v47, 6 }
0x148c   :  { %1894 = vmatmul.msk.f32.vlgmr.msra.gmra.mxu1 %vm1295_vm8, %v1586_v49 }
0x1509   :  { %v1606_v3 = vpop.f32.mrf.mxu1 }
0x150a   :  { %2033 = vlog2.f32 %v1606_v3 }
0x1510   :  { %v2034_v52 = vpop.eup %2033 }
0x1511   :  { %v1610_v54 = vmul.f32 0.6931472, %v2034_v52 }
0x1513   :  { %v1612_v35 = vrot.slane %v1610_v54, 2  ;;  %v1375_v54 = vperm.slane %v2558_v0, 4 }
0x1515   :  { %v1614_v60 = vadd.f32 %v1612_v35, %v1584_v55 }
0x1517   :  { %v1615_v62 = vadd.f32 %v1614_v60, %v2652_v16  ;;  %v1377_v60 = vmul.f32 %v1888_v25, %v1375_v54 }
0x1519   :  { %v1623_v63 = vrot.slane %v1615_v62, 6  ;;  %v1381_v62 = vsel %vm1295_vm8, %v1377_v60, 0.0 }
0x151b   :  { %v1628_v2 = vsel %vm1621_vm1, %v1623_v63, %v1626_v5 }
0x151c   :  { %v1629_v57 = vsel %vm1276_vm6, %v1628_v2, -inf  ;;  %v1667_v39 = vrot.slane %v1628_v2, 6 }
0x151d   :  { %1630 = vmax.xlane.f32.xlu1 %v1629_v57  ;;  %v1385_v57 = vsub.f32 1.0, %v2246_v4 }
0x1536   :  { %1262 = vperm.xlu1 %1954, %v2052_v6  }
0x1590   :  { %v1631_v8 = vpop.xlane.xlu1 %1630 }
0x1591   :  { %v1632_v58 = vsub.f32 %v1628_v2, %v1631_v8  ;;  %v1635_v13 = vadd.f32 %v1631_v8, %v2605_v1  ;;  %v1384_v2 = vsub.f32 1.0, %v2258_v19  ;;  %v1389_v8 = vrot.slane %v1385_v57, 2 }
0x1593   :  { %v1633_v9 = vmul.f32 1.442695, %v1632_v58  ;;  %v1388_v0 = vrot.slane %v1384_v2, 2 }
0x1595   :  { %2035 = vpow2.f32 %v1633_v9 }
0x159b   :  { %v2036_v10 = vpop.eup %2035 }
0x159c   :  { %1895 = vmatmul.msk.f32.vlgmr.msrb.gmra.mxu0 %vm1295_vm8, %v2036_v10 }
0x15a8   :  { %v1263_v20 = vpop.permute.xlu1 %1262 }
0x15a9   :  { %vm1267_vm0 = vcmp.eq.s32.totalorder %v2213_v26, %v1263_v20  ;;  %v1390_v20 = vsel %vm1289_vm3, %v1388_v0, %v1389_v8 }
0x15aa   :  { %v2671_v59 = vsel %vm1267_vm0, 1.0, %v2082_v31 }
0x15ab   :  { %1889 = vmatmul.msk.f32.vlgmr.msrb.gmra.mxu2 %vm1295_vm8, %v2671_v59  ;;  %v1325_v26 = vrot.slane %v2671_v59, 2  ;;  %v1376_v55 = vmul.f32 %v2671_v59, %v1375_v54 }
0x15ad   :  { %v1327_v28 = vsel %vm1289_vm3, %v1325_v26, %v1326_v18  ;;  %v1378_v35 = vsel %vm1295_vm8, %v1376_v55, 0.0 }
0x15b3   :  { %1890 = vmatmul.msk.f32.gmra.mxu2 %vm1295_vm8, %v1888_v25 }
0x1619   :  { %v1656_v11 = vpop.f32.mrf.mxu0 }
0x161a   :  { %2037 = vlog2.f32 %v1656_v11 }
0x1620   :  { %v2038_v12 = vpop.eup %2037 }
0x1621   :  { %v1660_v44 = vmul.f32 0.6931472, %v2038_v12 }
0x1623   :  { %v1661_v14 = vadd.f32 %v1660_v44, %v1635_v13 }
0x1625   :  { %v1662_v42 = vadd.f32 %v1661_v14, %v2652_v16  ;;  %v1393_v14 = vmul.f32 %v1390_v20, %v2258_v19 }
0x1627   :  { %v1664_v15 = vrot.slane %v1662_v42, 6 }
0x1629   :  { %v1669_v17 = vsel %vm1621_vm1, %v1664_v15, %v1667_v39 }
0x162a   :  { %v1670_v31 = vsel %vm1485_vm9, %v1669_v17, -inf  ;;  %v1712_v27 = vrot.slane %v1669_v17, 6  ;;  %vm1424_vm9 = vcmask 1024  }
0x162b   :  { %1671 = vmax.xlane.f32.xlu2 %v1670_v31 }
0x162e   :  { %v1319_v24 = vpop.f32.mrf.mxu2 }
0x162f   :  { %v1320_v30 = vadd.f32 %v1319_v24, %v1292_v22 }
0x1631   :  { %v1330_v48 = vmul.f32 %v1327_v28, %v1320_v30 }
0x1633   :  { %v1332_v53 = vsel %vm1295_vm8, %v1330_v48, 0.0 }
0x1636   :  { %v1322_v32 = vpop.f32.mrf.mxu2 }
0x1637   :  { %v1323_v29 = vadd.f32 %v1322_v32, %v2652_v16 }
0x1639   :  { %v1331_v36 = vmul.f32 %v1326_v18, %v1323_v29 }
0x163b   :  { %v1336_v34 = vsel %vm1335_vm5, %v1331_v36, 0.0 }
0x163c   :  { %1337 = vadd.xlane.f32.xlu0 %v1336_v34 }
0x169e   :  { %v1672_v38 = vpop.xlane.xlu2 %1671 }
0x169f   :  { %v1673_v40 = vsub.f32 %v1669_v17, %v1672_v38  ;;  %v1676_v46 = vadd.f32 %v1672_v38, %v2605_v1 }
0x16a1   :  { %v1674_v41 = vmul.f32 1.442695, %v1673_v40 }
0x16a3   :  { %2039 = vpow2.f32 %v1674_v41 }
0x16a9   :  { %v2040_v43 = vpop.eup %2039 }
0x16aa   :  { %v1678_v33 = vrot.slane %v2040_v43, 2 }
0x16ac   :  { %1896 = vmatmul.msk.f32.vlgmr.msra.gmra.mxu2 %vm1295_vm8, %v1678_v33 }
0x16af   :  { %v1338_v7 = vpop.xlane.xlu0 %1337 }
0x16b0   :  { %v1343_v9 = vrot.slane %v1338_v7, 6 }
0x172f   :  { %v1698_v23 = vpop.f32.mrf.mxu2 }
0x1730   :  { %2041 = vlog2.f32 %v1698_v23 }
0x1736   :  { %v2042_v45 = vpop.eup %2041 }
0x1737   :  { %v1702_v37 = vmul.f32 0.6931472, %v2042_v45 }
0x1739   :  { %v1704_v47 = vrot.slane %v1702_v37, 6 }
0x173b   :  { %v1706_v49 = vadd.f32 %v1704_v47, %v1676_v46  ;;  %v1394_v47 = vmul.f32 %v1389_v8, %v2246_v4 }
0x173d   :  { %v1707_v50 = vadd.f32 %v1706_v49, %v2652_v16 }
0x173f   :  { %v1709_v51 = vrot.slane %v1707_v50, 6  ;;  %v1275_v50 = vmul.f32 %v2671_v59, %v2580_v61 }
0x1741   :  { %v1714_v3 = vsel %vm1621_vm1, %v1709_v51, %v1712_v27  ;;  %v1277_v27 = vsel %vm1276_vm6, %v1275_v50, 0.0  ;;  %vm1790_vm6 = vcmask 0  }
0x1742   :  { %v1715_v52 = vsel %vm1531_vm10, %v1714_v3, -inf  ;;  %v1757_v30 = vrot.slane %v1714_v3, 6 }
0x1743   :  { %1716 = vmax.xlane.f32.xlu2 %v1715_v52 }
0x174b   :  { %1333 = vadd.xlane.f32.xlu2 %v1332_v53 }
0x1753   :  { %1379 = vadd.xlane.f32.xlu2 %v1378_v35 }
0x175b   :  { %1382 = vadd.xlane.f32.xlu2 %v1381_v62 }
0x17b6   :  { %v1717_v5 = vpop.xlane.xlu2 %1716 }
0x17b7   :  { %v1718_v63 = vsub.f32 %v1714_v3, %v1717_v5  ;;  %v1721_v22 = vadd.f32 %v1717_v5, %v2605_v1 }
0x17b9   :  { %v1719_v6 = vmul.f32 1.442695, %v1718_v63 }
0x17bb   :  { %2043 = vpow2.f32 %v1719_v6 }
0x17be   :  { %v1334_v58 = vpop.xlane.xlu2 %1333 }
0x17bf   :  { %v1342_v10 = vrot.slane %v1334_v58, 6 }
0x17c1   :  { %v2044_v56 = vpop.eup %2043  ;;  %v1344_v25 = vsel %vm1341_vm7, %v1342_v10, %v1343_v9  ;;  %v1347_v11 = vmul.f32 %v1342_v10, %v2258_v19 }
0x17c2   :  { %v1723_v12 = vrot.slane %v2044_v56, 4  ;;  %v1348_v13 = vmul.f32 %v1344_v25, %v2246_v4 }
0x17c3   :  { %v1351_v44 = vrot.slane %v1347_v11, 2 }
0x17c4   :  { %1897 = vmatmul.msk.f32.vlgmr.msrb.gmra.mxu3 %vm1295_vm8, %v1723_v12  ;;  %v1352_v42 = vrot.slane %v1348_v13, 2  ;;  %vm1360_vm8 = vcmask 7168  }
0x17c6   :  { %v1380_v39 = vpop.xlane.xlu2 %1379  ;;  %v1353_v15 = vsel %vm1289_vm3, %v1351_v44, %v1352_v42 }
0x17c7   :  { %v1395_v17 = vmul.f32 %v1393_v14, %v1380_v39  ;;  %1354 = vrot.lane.b32.xlu2 %v1353_v15, %s2094_s0 }
0x17c9   :  { %1399 = vrot.lane.b32.xlu0 %v1395_v17, %s2094_s0 }
0x17ce   :  { %v1383_v34 = vpop.xlane.xlu2 %1382 }
0x17cf   :  { %v1418_v38 = vmul.f32 %v1383_v34, %v2246_v4  ;;  %v1396_v49 = vmul.f32 %v1394_v47, %v1383_v34 }
0x17d1   :  { %v1420_v40 = vrot.slane %v1418_v38, 6 }
0x1821   :  { %v1355_v33 = vpop.permute.xlu2 %1354 }
0x1822   :  { %v1361_v45 = vsel %vm1360_vm8, %v1355_v33, 0.0 }
0x183b   :  { %v1400_v53 = vpop.permute.xlu0 %1399 }
0x183c   :  { %v1405_v4 = vsel %vm1360_vm8, %v1400_v53, 0.0 }
0x1847   :  { %v1743_v26 = vpop.f32.mrf.mxu3 }
0x1848   :  { %2045 = vlog2.f32 %v1743_v26 }
0x184e   :  { %v2046_v18 = vpop.eup %2045 }
0x184f   :  { %v1747_v31 = vmul.f32 0.6931472, %v2046_v18 }
0x1851   :  { %v1749_v24 = vrot.slane %v1747_v31, 4 }
0x1853   :  { %v1751_v19 = vadd.f32 %v1749_v24, %v1721_v22 }
0x1855   :  { %v1752_v28 = vadd.f32 %v1751_v19, %v2652_v16 }
0x1857   :  { %v1754_v48 = vrot.slane %v1752_v28, 6 }
0x1859   :  { %v1759_v32 = vsel %vm1621_vm1, %v1754_v48, %v1757_v30 }
0x185a   :  { %v1760_v29 = vadd.f32 %v1759_v32, %v1375_v54 }
0x185c   :  { %v1761_v36 = vsel %vm1577_vm12, %v1760_v29, -inf }
0x185d   :  { %1762 = vmax.xlane.f32.xlu1 %v1761_v36 }
0x1876   :  { %1356 = vrot.lane.b32.xlu1 %v1352_v42, %s2094_s0 }
0x187e   :  { %1421 = vrot.lane.b32.xlu1 %v1420_v40, %s2094_s0 }
0x18d0   :  { %v1763_v1 = vpop.xlane.xlu1 %1762 }
0x18d1   :  { %v1764_v41 = vsub.f32 %v1760_v29, %v1763_v1 }
0x18d3   :  { %v1765_v16 = vmul.f32 1.442695, %v1764_v41 }
0x18d5   :  { %2047 = vpow2.f32 %v1765_v16 }
0x18db   :  { %v2048_v43 = vpop.eup %2047 }
0x18dc   :  { %v1767_v21 = vsel %vm1577_vm12, %v2048_v43, 0.0 }
0x18dd   :  { %1768 = vadd.xlane.f32.xlu2 %v1767_v21 }
0x18e8   :  { %v1357_v23 = vpop.permute.xlu1 %1356 }
0x18e9   :  { %v1363_v37 = vsel %vm1362_vm4, %v1357_v23, 0.0 }
0x18ea   :  { %v1364_v46 = vadd.f32 %v1363_v37, %v1361_v45 }
0x18ec   :  { %1365 = vadd.xlane.f32.xlu0 %v1364_v46 }
0x18f0   :  { %v1422_v51 = vpop.permute.xlu1 %1421 }
0x18f1   :  { %v1425_v3 = vsel %vm1424_vm9, %v1422_v51, 0.0 }
0x18f5   :  { %1401 = vrot.lane.b32.xlu2 %v1396_v49, %s2094_s0 }
0x191e   :  { %1278 = vadd.xlane.f32.xlu2 %v1277_v27 }
0x1926   :  { %1426 = vadd.xlane.f32.xlu2 %v1425_v3 }
0x1950   :  { %v1769_v52 = vpop.xlane.xlu2 %1768 }
0x1951   :  { %2049 = vlog2.f32 %v1769_v52 }
0x1957   :  { %v2050_v54 = vpop.eup %2049 }
0x1958   :  { %v1771_v55 = vmul.f32 0.6931472, %v2050_v54  ;;  %v1402_v35 = vpop.permute.xlu2 %1401 }
0x1959   :  { %v1406_v60 = vsel %vm1362_vm4, %v1402_v35, 0.0 }
0x195a   :  { %v1407_v62 = vadd.f32 %v1406_v60, %v1405_v4  ;;  %v1772_v5 = vadd.f32 %v1771_v55, %v1763_v1 }
0x195c   :  { %1408 = vadd.xlane.f32.xlu1 %v1407_v62  ;;  %v1774_v61 = vrot.slane %v1772_v5, 6 }
0x195e   :  { %v1776_v59 = vsel %vm1424_vm9, %v1774_v61, 0.0 }
0x195f   :  { %1777 = vadd.xlane.f32.xlu0 %v1776_v59  ;;  %v1366_v63 = vpop.xlane.xlu0 %1365 }
0x1960   :  { %v1367_v2 = vrot.slane %v1366_v63, 4 }
0x1962   :  { %v1368_v57 = vadd.f32 %v1367_v2, %v1366_v63 }
0x1964   :  { %v1369_v6 = vrot.slane %v1368_v57, 2 }
0x1966   :  { %v1370_v58 = vadd.f32 %v1369_v6, %v1368_v57 }
0x1968   :  { %v1371_v20 = vrot.slane %v1370_v58, 1 }
0x196a   :  { %v1372_v11 = vadd.f32 %v1371_v20, %v1370_v58 }
0x1991   :  { %v1279_v7 = vpop.xlane.xlu2 %1278 }
0x1992   :  { %v1280_v0 = vrot.slane %v1279_v7, 4 }
0x1994   :  { %v1281_v8 = vadd.f32 %v1280_v0, %v1279_v7 }
0x1996   :  { %v1282_v9 = vrot.slane %v1281_v8, 2 }
0x1998   :  { %v1283_v10 = vadd.f32 %v1282_v9, %v1281_v8 }
0x1999   :  { %v1427_v12 = vpop.xlane.xlu2 %1426 }
0x199a   :  { %v1284_v56 = vrot.slane %v1283_v10, 1  ;;  %v1428_v13 = vrot.slane %v1427_v12, 4 }
0x199c   :  { %v1285_v25 = vadd.f32 %v1284_v56, %v1283_v10  ;;  %v1429_v44 = vadd.f32 %v1428_v13, %v1427_v12 }
0x199e   :  { %1898 = vpush %v1285_v25  ;;  %v1430_v14 = vrot.slane %v1429_v44, 2 }
0x199f   :  { %1900 = vpush %v1372_v11 }
0x19a0   :  { %v1431_v26 = vadd.f32 %v1430_v14, %v1429_v44 }
0x19a2   :  { %v1432_v28 = vrot.slane %v1431_v26, 1 }
0x19a4   :  { %v1433_v29 = vadd.f32 %v1432_v28, %v1431_v26 }
0x19cf   :  { %v1409_v42 = vpop.xlane.xlu1 %1408  ;;  %s1899_s7 = spop %1898 }
0x19d0   :  { %v1410_v39 = vrot.slane %v1409_v42, 4  ;;  %s1901_s27 = spop %1900 }
0x19d1   :  { %s1374_s28 = sadd.f32 %s1901_s27, %s1899_s7 }
0x19d2   :  { %v1411_v15 = vadd.f32 %v1410_v39, %v1409_v42  ;;  %v1778_v17 = vpop.xlane.xlu0 %1777 }
0x19d3   :  { %v1779_v18 = vrot.slane %v1778_v17, 4 }
0x19d4   :  { %v1412_v31 = vrot.slane %v1411_v15, 2 }
0x19d5   :  { %v1780_v22 = vadd.f32 %v1779_v18, %v1778_v17 }
0x19d6   :  { %v1413_v24 = vadd.f32 %v1412_v31, %v1411_v15 }
0x19d7   :  { %v1781_v19 = vrot.slane %v1780_v22, 2 }
0x19d8   :  { %v1414_v30 = vrot.slane %v1413_v24, 1 }
0x19d9   :  { %v1782_v48 = vadd.f32 %v1781_v19, %v1780_v22 }
0x19da   :  { %v1415_v32 = vadd.f32 %v1414_v30, %v1413_v24 }
0x19db   :  { %v1783_v36 = vrot.slane %v1782_v48, 1 }
0x19dc   :  { %1902 = vpush %v1415_v32 }
0x19dd   :  { %1904 = vpush %v1433_v29  ;;  %v1784_v34 = vadd.f32 %v1783_v36, %v1782_v48 }
0x19df   :  { %1906 = vpush %v1784_v34 }
0x1a0d   :  { %s1903_s2 = spop %1902 }
0x1a0e   :  { %s1417_s14 = sadd.f32 %s1903_s2, %s1374_s28  ;;  %s1905_s15 = spop %1904 }
0x1a10   :  { %s1435_s16 = sadd.f32 %s1905_s15, %s1417_s14  ;;  %s1907_s17 = spop %1906 }
0x1a12   :  { %s1786_s18 = ssub.f32 %s1435_s16, %s1907_s17 }
0x1a14   :  { %s1787_s5 = ssub.f32 0.0, %s1786_s18 }
0x1a16   :  { %s1788_s11 = smul.f32 0.5, %s1787_s5 }
0x1a18   :  { %v1789_v38 = vstv %s1788_s11 }
0x1a19   :  { %1791 = vst.msk [vmem:[#allocation2] sm:$0x1] %vm1790_vm6, %v1789_v38 }
0x1a1a   :  { %1802 = dma.vmem_to_hbm [thread:$0]  %s1798_s30, 16, %s1800_s10, [#allocation3]  }
0x1a1b   :  { %2077 = dma.done.wait [#allocation3], 16  }
0x1a1c   :  { %2078 = vsyncadd [#allocation3], 4294967280 }
0x1a1d   :  { %1807 = vsyncpa [#allocation3], 1 }

</bundles_post_ra>
